<compile_context>
chip_gen: v6e
topology: v6e:2x2x1
jax: 0.10.0
libtpu: 0.0.40
codegen_flags: <defaults>
</compile_context>

<pallas_src>
import functools

import jax
import jax.numpy as jnp
from jax.experimental import pallas as pl
from jax.experimental.pallas import tpu as pltpu


# ----------------------------- Pallas kernel --------------------------------


def _critic_kernel(s_ref, a_ref, w1_ref, w2_ref, w3_ref, b_ref, q_ref,
                   *, fp, ap, h1p, h2p):
    """Both critic heads (3-layer MLP each) for one batch tile.

    Slab layouts (host-prepared, all slices below are tile-aligned):
      w1_ref : (fp+ap, 2*h1p) bf16   rows [0:fp]=W1_state, [fp:fp+ap]=W1_action,
                                     cols [0:h1p]=head A, [h1p:]=head B
      w2_ref : (2*h1p, h2p)   bf16   rows [0:h1p]=head A, [h1p:]=head B
      w3_ref : (2*h2p, 128)   bf16   rows [0:h2p]=head A (col 0), rest head B (col 1)
      b_ref  : (1, 2*h1p + 2*h2p + 128) f32  [b1_A|b1_B | b2_A | b2_B | b3(lanes 0,1)]
    """
    s = s_ref[...]                                    # (TB, fp)  bf16
    a = a_ref[...]                                    # (TB, ap)  bf16

    b1 = b_ref[:, 0:2 * h1p]                          # (1, 2*h1p)
    b2a = b_ref[:, 2 * h1p:2 * h1p + h2p]             # (1, h2p)
    b2b = b_ref[:, 2 * h1p + h2p:2 * h1p + 2 * h2p]   # (1, h2p)
    b3 = b_ref[:, 2 * h1p + 2 * h2p:]                 # (1, 128)

    # Layer 1: both heads fused along N (2 matmuls instead of 4).
    h1 = (jnp.dot(s, w1_ref[0:fp, :], preferred_element_type=jnp.float32)
          + jnp.dot(a, w1_ref[fp:fp + ap, :], preferred_element_type=jnp.float32)
          + b1)
    h1 = jnp.maximum(h1, 0.0).astype(jnp.bfloat16)    # (TB, 2*h1p)

    # Layer 2: per head (lane-aligned slices of h1 / sublane-aligned slab slices).
    h2a = (jnp.dot(h1[:, 0:h1p], w2_ref[0:h1p, :],
                   preferred_element_type=jnp.float32) + b2a)
    h2b = (jnp.dot(h1[:, h1p:2 * h1p], w2_ref[h1p:2 * h1p, :],
                   preferred_element_type=jnp.float32) + b2b)
    h2a = jnp.maximum(h2a, 0.0).astype(jnp.bfloat16)  # (TB, h2p)
    h2b = jnp.maximum(h2b, 0.0).astype(jnp.bfloat16)  # (TB, h2p)

    # Layer 3 on the MXU: q1 lands in lane 0, q2 in lane 1, other lanes zero.
    q_ref[...] = (jnp.dot(h2a, w3_ref[0:h2p, :],
                          preferred_element_type=jnp.float32)
                  + jnp.dot(h2b, w3_ref[h2p:2 * h2p, :],
                            preferred_element_type=jnp.float32)
                  + b3)                               # (TB, 128) f32, lane-dense


# ------------------------------ host helpers ---------------------------------


def _round_up(n, m):
    return ((n + m - 1) // m) * m


def _choose_batch_tile(b):
    """Largest tile (<=1024) giving >=2 grid steps for mid/large batches.

    Tiny batches run as a single step; mid batches split in two so the
    "parallel" batch axis actually shards across both v7x TensorCores; big
    batches cap at 1024 rows/tile (2-4 steps) to amortize ~0.35us/step overhead.
    """
    b = max(int(b), 1)
    if b <= 16:
        return _round_up(b, 8)
    return min(1024, _round_up((b + 1) // 2, 8))


def init_critic_params(key, in_dim, net_arch):
    """Deterministic init (PyTorch-Linear-style uniform, fan-in scaled).

    Weights are stored as (in_features, out_features): the math is x @ W + b
    (transpose of torch.nn.Linear's weight layout).
    """
    dims = [in_dim] + list(net_arch) + [1]
    params = []
    for _ in range(2):                      # n_critics = 2
        for li in range(len(dims) - 1):
            fan_in, fan_out = dims[li], dims[li + 1]
            key, kw, kb = jax.random.split(key, 3)
            bound = 1.0 / float(fan_in) ** 0.5
            w = jax.random.uniform(kw, (fan_in, fan_out), jnp.float32,
                                   -bound, bound)
            b = jax.random.uniform(kb, (1, fan_out), jnp.float32,
                                   -bound, bound)
            params.extend([w, b])
    return tuple(params)


def prep_critic_params(params, state_dim, action_dim, lane=128, row=16):
    """One-time host prep: fuse/pad/pack the 14 tensors into 4 slabs.

    Returns (w1_slab, w2_slab, w3_slab, bias_slab). Row granularity is 16 so
    bf16 sublane-packed tiles are never straddled by the in-kernel slices.
    """
    (w1a_, b1a_, w2a_, b2a_, w3a_, b3a_,
     w1b_, b1b_, w2b_, b2b_, w3b_, b3b_) = params

    f, a = state_dim, action_dim
    fp, ap = _round_up(f, row), _round_up(a, row)
    h1, h2 = w1a_.shape[1], w2a_.shape[1]
    h1p, h2p = _round_up(h1, lane), _round_up(h2, lane)

    def pad_to(x, shape):
        return jnp.pad(x, [(0, t - s) for s, t in zip(x.shape, shape)])

    def split_pad_w1(w1):
        ws = pad_to(w1[:f], (fp, h1p))            # (fp, h1p)
        wa = pad_to(w1[f:f + a], (ap, h1p))       # (ap, h1p)
        return ws, wa

    w1s_a, w1a_a = split_pad_w1(w1a_)
    w1s_b, w1a_b = split_pad_w1(w1b_)

    # Layer-1 slab: heads fused along N, state/action rows stacked along K.
    w1_slab = jnp.concatenate(
        [jnp.concatenate([w1s_a, w1s_b], axis=1),
         jnp.concatenate([w1a_a, w1a_b], axis=1)], axis=0).astype(jnp.bfloat16)

    # Layer-2 slab: heads stacked along K.
    w2_slab = jnp.concatenate(
        [pad_to(w2a_, (h1p, h2p)), pad_to(w2b_, (h1p, h2p))],
        axis=0).astype(jnp.bfloat16)

    # Layer-3 slab: head A's vector in column 0, head B's in column 1.
    w3a_col = pad_to(w3a_.reshape(h2, 1), (h2p, lane))                     # col 0
    w3b_col = jnp.pad(w3b_.reshape(h2, 1), ((0, h2p - h2), (1, lane - 2)))  # col 1
    w3_slab = jnp.concatenate([w3a_col, w3b_col], axis=0).astype(jnp.bfloat16)

    # Bias slab (f32): [b1_A | b1_B | b2_A | b2_B | b3 in lanes 0/1].
    b1_fused = jnp.concatenate([pad_to(b1a_.reshape(1, h1), (1, h1p)),
                                pad_to(b1b_.reshape(1, h1), (1, h1p))], axis=1)
    b2a_p = pad_to(b2a_.reshape(1, h2), (1, h2p))
    b2b_p = pad_to(b2b_.reshape(1, h2), (1, h2p))
    b3_p = (jnp.zeros((1, lane), jnp.float32)
            .at[0, 0].set(b3a_.reshape(()))
            .at[0, 1].set(b3b_.reshape(())))
    bias_slab = jnp.concatenate([b1_fused, b2a_p, b2b_p, b3_p],
                                axis=1).astype(jnp.float32)

    return (w1_slab, w2_slab, w3_slab, bias_slab)


# ------------------------------- forward pass --------------------------------


@jax.jit
def critic_forward(obs, actions, prepped):
    """obs: (B, state_dim), actions: (B, action_dim). Returns (q1, q2), (B,1) f32."""
    w1_slab, w2_slab, w3_slab, bias_slab = prepped

    # Feature extractor = Flatten (identity on already-flat vector obs).
    states = obs.reshape(obs.shape[0], -1).astype(jnp.bfloat16)
    acts = actions.reshape(actions.shape[0], -1).astype(jnp.bfloat16)

    B, F = states.shape
    A = acts.shape[1]
    fp, ap = _round_up(F, 16), _round_up(A, 16)
    h1p = w2_slab.shape[0] // 2
    h2p = w2_slab.shape[1]
    assert w1_slab.shape[0] == fp + ap, "prepped params do not match input dims"

    TB = _choose_batch_tile(B)
    B_pad = _round_up(B, TB)

    states = jnp.pad(states, ((0, B_pad - B), (0, fp - F)))
    acts = jnp.pad(acts, ((0, B_pad - B), (0, ap - A)))

    kernel = functools.partial(_critic_kernel, fp=fp, ap=ap, h1p=h1p, h2p=h2p)

    def resident(shape):
        # Constant block index -> slab stays VMEM-resident across batch tiles.
        return pl.BlockSpec(shape, lambda i: (0, 0))

    q = pl.pallas_call(
        kernel,
        grid=(B_pad // TB,),
        in_specs=[pl.BlockSpec((TB, fp), lambda i: (i, 0)),
                  pl.BlockSpec((TB, ap), lambda i: (i, 0)),
                  resident(w1_slab.shape),
                  resident(w2_slab.shape),
                  resident(w3_slab.shape),
                  resident(bias_slab.shape)],
        out_specs=pl.BlockSpec((TB, 128), lambda i: (i, 0)),
        out_shape=jax.ShapeDtypeStruct((B_pad, 128), jnp.float32),
        compiler_params=pltpu.CompilerParams(
            dimension_semantics=("parallel",),
            vmem_limit_bytes=48 * 1024 * 1024),
    )(states, acts, w1_slab, w2_slab, w3_slab, bias_slab)

    # q1 in lane 0, q2 in lane 1; padded batch rows are sliced off.
    return q[:B, 0:1], q[:B, 1:2]


# ----------------------------- references (JAX) -------------------------------


def critic_forward_ref(obs, actions, params):
    """Follows the kernel's dtype path: bf16 inputs/weights/activations, f32 acc."""
    states = obs.reshape(obs.shape[0], -1)
    x = jnp.concatenate([states, actions], axis=1).astype(jnp.bfloat16)
    (w1a, b1a, w2a, b2a, w3a, b3a, w1b, b1b, w2b, b2b, w3b, b3b) = params

    def head(w1, b1, w2, b2, w3, b3):
        h = jnp.dot(x, w1.astype(jnp.bfloat16),
                    preferred_element_type=jnp.float32) + b1
        h = jnp.maximum(h, 0.0).astype(jnp.bfloat16)
        h = jnp.dot(h, w2.astype(jnp.bfloat16),
                    preferred_element_type=jnp.float32) + b2
        h = jnp.maximum(h, 0.0).astype(jnp.bfloat16)
        return jnp.dot(h, w3.astype(jnp.bfloat16),
                       preferred_element_type=jnp.float32) + b3

    return (head(w1a, b1a, w2a, b2a, w3a, b3a),
            head(w1b, b1b, w2b, b2b, w3b, b3b))


def critic_forward_f32_ref(obs, actions, params):
    """Original (pure f32) module semantics, for a loose sanity check."""
    states = obs.reshape(obs.shape[0], -1)
    x = jnp.concatenate([states, actions], axis=1)
    (w1a, b1a, w2a, b2a, w3a, b3a, w1b, b1b, w2b, b2b, w3b, b3b) = params

    def mlp(w1, b1, w2, b2, w3, b3):
        h = jnp.maximum(x @ w1 + b1, 0.0)
        h = jnp.maximum(h @ w2 + b2, 0.0)
        return h @ w3 + b3

    return (mlp(w1a, b1a, w2a, b2a, w3a, b3a),
            mlp(w1b, b1b, w2b, b2b, w3b, b3b))


# ----------------------------------- main ------------------------------------


if __name__ == "__main__":
    state_dim = 16
    action_dim = 4
    net_arch = [400, 300]          # module default

    key = jax.random.PRNGKey(0)
    k_obs, k_act, k_par = jax.random.split(key, 3)

    params = init_critic_params(k_par, state_dim + action_dim, net_arch)
    prepped = prep_critic_params(params, state_dim, action_dim)

    for batch in (8, 64):          # single-step grid and 2-step (megacore) grid
        ko, ka = jax.random.split(jax.random.fold_in(k_obs, batch))
        obs = jax.random.normal(ko, (batch, state_dim), jnp.float32)
        actions = jax.random.normal(ka, (batch, action_dim), jnp.float32)

        q1, q2 = critic_forward(obs, actions, prepped)
        jax.block_until_ready((q1, q2))

        assert q1.shape == (batch, 1) and q2.shape == (batch, 1)

        # Tight check vs. a reference that follows the kernel's dtype path.
        q1_ref, q2_ref = critic_forward_ref(obs, actions, params)
        assert jnp.allclose(q1, q1_ref, atol=2e-3, rtol=2e-3)
        assert jnp.allclose(q2, q2_ref, atol=2e-3, rtol=2e-3)

        # Loose check vs. the original pure-f32 module semantics (bf16 error).
        q1_f32, q2_f32 = critic_forward_f32_ref(obs, actions, params)
        assert jnp.allclose(q1, q1_f32, atol=1e-1, rtol=1e-1)
        assert jnp.allclose(q2, q2_f32, atol=1e-1, rtol=1e-1)

    print("KERNEL_OK")
</pallas_src>

<mosaic_0001>
module attributes {stable_mosaic.version = 11 : i64} {
  func.func @_critic_kernel(%arg0: i32, %arg1: memref<8x16xbf16, #tpu.memory_space<vmem>>, %arg2: memref<8x16xbf16, #tpu.memory_space<vmem>>, %arg3: memref<32x1024xbf16, #tpu.memory_space<vmem>>, %arg4: memref<1024x384xbf16, #tpu.memory_space<vmem>>, %arg5: memref<768x128xbf16, #tpu.memory_space<vmem>>, %arg6: memref<1x1920xf32, #tpu.memory_space<vmem>>, %arg7: memref<8x128xf32, #tpu.memory_space<vmem>>) attributes {dimension_semantics = [#tpu.dimension_semantics<parallel>], iteration_bounds = array<i64: 1>, scalar_prefetch = 0 : i64, scratch_operands = 0 : i64, tpu.core_type = #tpu.core_type<tc>, window_params = [{transform_indices = @transform_0, window_bounds = array<i64: 8, 16>}, {transform_indices = @transform_1, window_bounds = array<i64: 8, 16>}, {pipeline_mode = #tpu.pipeline_mode<synchronous>, transform_indices = @transform_2, window_bounds = array<i64: 32, 1024>}, {pipeline_mode = #tpu.pipeline_mode<synchronous>, transform_indices = @transform_3, window_bounds = array<i64: 1024, 384>}, {pipeline_mode = #tpu.pipeline_mode<synchronous>, transform_indices = @transform_4, window_bounds = array<i64: 768, 128>}, {pipeline_mode = #tpu.pipeline_mode<synchronous>, transform_indices = @transform_5, window_bounds = array<i64: 1, 1920>}, {transform_indices = @transform_6, window_bounds = array<i64: 8, 128>}]} {
    %c0 = arith.constant 0 : index
    %c0_0 = arith.constant 0 : index
    %0 = vector.load %arg1[%c0, %c0_0] : memref<8x16xbf16, #tpu.memory_space<vmem>>, vector<8x16xbf16>
    %c0_1 = arith.constant 0 : index
    %c0_2 = arith.constant 0 : index
    %1 = vector.load %arg2[%c0_1, %c0_2] : memref<8x16xbf16, #tpu.memory_space<vmem>>, vector<8x16xbf16>
    %c0_3 = arith.constant 0 : index
    %c0_4 = arith.constant 0 : index
    %2 = vector.load %arg6[%c0_3, %c0_4] : memref<1x1920xf32, #tpu.memory_space<vmem>>, vector<1x1024xf32>
    %c0_5 = arith.constant 0 : index
    %c1024 = arith.constant 1024 : index
    %3 = vector.load %arg6[%c0_5, %c1024] : memref<1x1920xf32, #tpu.memory_space<vmem>>, vector<1x384xf32>
    %c0_6 = arith.constant 0 : index
    %c1408 = arith.constant 1408 : index
    %4 = vector.load %arg6[%c0_6, %c1408] : memref<1x1920xf32, #tpu.memory_space<vmem>>, vector<1x384xf32>
    %c0_7 = arith.constant 0 : index
    %c1792 = arith.constant 1792 : index
    %5 = vector.load %arg6[%c0_7, %c1792] : memref<1x1920xf32, #tpu.memory_space<vmem>>, vector<1x128xf32>
    %c0_8 = arith.constant 0 : index
    %c0_9 = arith.constant 0 : index
    %6 = vector.load %arg3[%c0_8, %c0_9] : memref<32x1024xbf16, #tpu.memory_space<vmem>>, vector<16x1024xbf16>
    %cst = arith.constant dense<0.000000e+00> : vector<8x1024xf32>
    %7 = tpu.matmul %0, %6, %cst {dimension_numbers = #tpu.dot_dimension_numbers<[1], [0], [0], [1], [0, 0, 1, 1], [], []>} : vector<8x16xbf16>, vector<16x1024xbf16>, vector<8x1024xf32> -> vector<8x1024xf32>
    %c16 = arith.constant 16 : index
    %c0_10 = arith.constant 0 : index
    %8 = vector.load %arg3[%c16, %c0_10] : memref<32x1024xbf16, #tpu.memory_space<vmem>>, vector<16x1024xbf16>
    %cst_11 = arith.constant dense<0.000000e+00> : vector<8x1024xf32>
    %9 = tpu.matmul %1, %8, %cst_11 {dimension_numbers = #tpu.dot_dimension_numbers<[1], [0], [0], [1], [0, 0, 1, 1], [], []>} : vector<8x16xbf16>, vector<16x1024xbf16>, vector<8x1024xf32> -> vector<8x1024xf32>
    %10 = arith.addf %7, %9 : vector<8x1024xf32>
    %11 = vector.broadcast %2 : vector<1x1024xf32> to vector<8x1024xf32>
    %12 = arith.addf %10, %11 : vector<8x1024xf32>
    %cst_12 = arith.constant 0.000000e+00 : f32
    %13 = vector.broadcast %cst_12 : f32 to vector<8x1024xf32>
    %14 = arith.maximumf %12, %13 : vector<8x1024xf32>
    %15 = arith.truncf %14 : vector<8x1024xf32> to vector<8x1024xbf16>
    %16 = vector.extract_strided_slice %15 {offsets = [0, 0], sizes = [8, 512], strides = [1, 1]} : vector<8x1024xbf16> to vector<8x512xbf16>
    %c0_13 = arith.constant 0 : index
    %c0_14 = arith.constant 0 : index
    %17 = vector.load %arg4[%c0_13, %c0_14] : memref<1024x384xbf16, #tpu.memory_space<vmem>>, vector<512x384xbf16>
    %cst_15 = arith.constant dense<0.000000e+00> : vector<8x384xf32>
    %18 = tpu.matmul %16, %17, %cst_15 {dimension_numbers = #tpu.dot_dimension_numbers<[1], [0], [0], [1], [0, 0, 1, 1], [], []>} : vector<8x512xbf16>, vector<512x384xbf16>, vector<8x384xf32> -> vector<8x384xf32>
    %19 = vector.broadcast %3 : vector<1x384xf32> to vector<8x384xf32>
    %20 = arith.addf %18, %19 : vector<8x384xf32>
    %21 = vector.extract_strided_slice %15 {offsets = [0, 512], sizes = [8, 512], strides = [1, 1]} : vector<8x1024xbf16> to vector<8x512xbf16>
    %c512 = arith.constant 512 : index
    %c0_16 = arith.constant 0 : index
    %22 = vector.load %arg4[%c512, %c0_16] : memref<1024x384xbf16, #tpu.memory_space<vmem>>, vector<512x384xbf16>
    %cst_17 = arith.constant dense<0.000000e+00> : vector<8x384xf32>
    %23 = tpu.matmul %21, %22, %cst_17 {dimension_numbers = #tpu.dot_dimension_numbers<[1], [0], [0], [1], [0, 0, 1, 1], [], []>} : vector<8x512xbf16>, vector<512x384xbf16>, vector<8x384xf32> -> vector<8x384xf32>
    %24 = vector.broadcast %4 : vector<1x384xf32> to vector<8x384xf32>
    %25 = arith.addf %23, %24 : vector<8x384xf32>
    %cst_18 = arith.constant 0.000000e+00 : f32
    %26 = vector.broadcast %cst_18 : f32 to vector<8x384xf32>
    %27 = arith.maximumf %20, %26 : vector<8x384xf32>
    %28 = arith.truncf %27 : vector<8x384xf32> to vector<8x384xbf16>
    %cst_19 = arith.constant 0.000000e+00 : f32
    %29 = vector.broadcast %cst_19 : f32 to vector<8x384xf32>
    %30 = arith.maximumf %25, %29 : vector<8x384xf32>
    %31 = arith.truncf %30 : vector<8x384xf32> to vector<8x384xbf16>
    %c0_20 = arith.constant 0 : index
    %c0_21 = arith.constant 0 : index
    %32 = vector.load %arg5[%c0_20, %c0_21] : memref<768x128xbf16, #tpu.memory_space<vmem>>, vector<384x128xbf16>
    %cst_22 = arith.constant dense<0.000000e+00> : vector<8x128xf32>
    %33 = tpu.matmul %28, %32, %cst_22 {dimension_numbers = #tpu.dot_dimension_numbers<[1], [0], [0], [1], [0, 0, 1, 1], [], []>} : vector<8x384xbf16>, vector<384x128xbf16>, vector<8x128xf32> -> vector<8x128xf32>
    %c384 = arith.constant 384 : index
    %c0_23 = arith.constant 0 : index
    %34 = vector.load %arg5[%c384, %c0_23] : memref<768x128xbf16, #tpu.memory_space<vmem>>, vector<384x128xbf16>
    %cst_24 = arith.constant dense<0.000000e+00> : vector<8x128xf32>
    %35 = tpu.matmul %31, %34, %cst_24 {dimension_numbers = #tpu.dot_dimension_numbers<[1], [0], [0], [1], [0, 0, 1, 1], [], []>} : vector<8x384xbf16>, vector<384x128xbf16>, vector<8x128xf32> -> vector<8x128xf32>
    %36 = arith.addf %33, %35 : vector<8x128xf32>
    %37 = vector.broadcast %5 : vector<1x128xf32> to vector<8x128xf32>
    %38 = arith.addf %36, %37 : vector<8x128xf32>
    %c0_25 = arith.constant 0 : index
    %c0_26 = arith.constant 0 : index
    %39 = vector.load %arg7[%c0_25, %c0_26] : memref<8x128xf32, #tpu.memory_space<vmem>>, vector<8x128xf32>
    tpu.vector_store %arg7[%c0_25, %c0_26], %38 {strides = array<i32>} : memref<8x128xf32, #tpu.memory_space<vmem>>, vector<8x128xf32>,
    return
  }
  func.func @transform_0(%arg0: i32) -> (i32, i32) {
    %c0_i32 = arith.constant 0 : i32
    %c0_i32_0 = arith.constant 0 : i32
    return %arg0, %c0_i32 : i32, i32
  }
  func.func @transform_1(%arg0: i32) -> (i32, i32) {
    %c0_i32 = arith.constant 0 : i32
    %c0_i32_0 = arith.constant 0 : i32
    return %arg0, %c0_i32 : i32, i32
  }
  func.func @transform_2(%arg0: i32) -> (i32, i32) {
    %c0_i32 = arith.constant 0 : i32
    %c0_i32_0 = arith.constant 0 : i32
    %c0_i32_1 = arith.constant 0 : i32
    return %c0_i32, %c0_i32_0 : i32, i32
  }
  func.func @transform_3(%arg0: i32) -> (i32, i32) {
    %c0_i32 = arith.constant 0 : i32
    %c0_i32_0 = arith.constant 0 : i32
    %c0_i32_1 = arith.constant 0 : i32
    return %c0_i32, %c0_i32_0 : i32, i32
  }
  func.func @transform_4(%arg0: i32) -> (i32, i32) {
    %c0_i32 = arith.constant 0 : i32
    %c0_i32_0 = arith.constant 0 : i32
    %c0_i32_1 = arith.constant 0 : i32
    return %c0_i32, %c0_i32_0 : i32, i32
  }
  func.func @transform_5(%arg0: i32) -> (i32, i32) {
    %c0_i32 = arith.constant 0 : i32
    %c0_i32_0 = arith.constant 0 : i32
    %c0_i32_1 = arith.constant 0 : i32
    return %c0_i32, %c0_i32_0 : i32, i32
  }
  func.func @transform_6(%arg0: i32) -> (i32, i32) {
    %c0_i32 = arith.constant 0 : i32
    %c0_i32_0 = arith.constant 0 : i32
    return %arg0, %c0_i32 : i32, i32
  }
}

</mosaic_0001>

<bundles_post_ra>
// kernel: critic_forward.1
= control target key start
LH: loop header
LB: loop body
LE: loop exit
PB: predicated region body
PF: predicated region fallthrough
CT: control target
= control target key end

     0   :  { %11 = vsyncpa [#allocation3], 0  ;;  %s3801_s0 = inlined_call_operand.vmem [shape: bf16[8,16], index: 0, kind: input, shape index: {}]   ;;  %s3802_s1 = inlined_call_operand.vmem [shape: bf16[8,16], index: 1, kind: input, shape index: {}]   ;;  %s3803_s2 = inlined_call_operand.hbm [shape: bf16[32,1024], index: 2, kind: input, shape index: {}]   ;;  %s3804_s3 = inlined_call_operand.hbm [shape: bf16[1024,384], index: 3, kind: input, shape index: {}]   ;;  %s3805_s4 = inlined_call_operand.hbm [shape: bf16[768,128], index: 4, kind: input, shape index: {}]   ;;  %s3806_s5 = inlined_call_operand.vmem [shape: f32[1,1920], index: 5, kind: input, shape index: {}]   ;;  %s3807_s6 = inlined_call_operand.vmem [shape: f32[8,128], index: 6, kind: output, shape index: {}]  }
   0x1   :  { %12 = vsyncpa [#allocation5], 0  ;;  %s3608_s21 = smov [#allocation4]  }
   0x2   :  { %s34_s22 = sshll.u32 %s3608_s21, 4  ;;  %s35_s22 = int_to_ptr.vmem [resolvable:$true] %s34_s22 }
   0x3   :  { %s3552_s23 = scalar_lea.vmem %s35_s22, 24576  ;;  %p3557_p1 = scmp.lt.s32.totalorder %s35_s22, %s35_s22 }
   0x4   :  { %p3553_p0 = scmp.ne.s32.totalorder %s35_s22, %s3552_s23  ;;  %p3558_p2 = scmp.lt.s32.totalorder %s3552_s23, %s3552_s23 }
   0x6   :  { %p3559_p3 = por %p3558_p2, %p3557_p1 }
   0x8   :  { %p3560_p4 = pnand %p3559_p3, %p3553_p0 }
   0xa   :  { %3563 = shalt.err (!%p3560_p4)
}
   0xb   :  { %s3609_s24 = smov 192   ;;  %s3610_s25 = smov 12  }
   0xc   :  { %40 = dma.hbm_to_vmem [thread:$0]  %s3804_s3, 24576, %s35_s22, [#allocation5], %s3609_s24, %s3609_s24, %s3610_s25  }
   0xd   :  { %s3611_s28 = smov [#allocation2]  }
   0xe   :  { %s22_s29 = sshll.u32 %s3611_s28, 4  ;;  %s23_s29 = int_to_ptr.vmem [resolvable:$true] %s22_s29 }
   0xf   :  { %s3572_s30 = scalar_lea.vmem %s23_s29, 2048  ;;  %p3577_p6 = scmp.lt.s32.totalorder %s23_s29, %s23_s29 }
  0x10   :  { %p3573_p5 = scmp.ne.s32.totalorder %s23_s29, %s3572_s30  ;;  %p3578_p7 = scmp.lt.s32.totalorder %s3572_s30, %s3572_s30 }
  0x12   :  { %p3579_p8 = por %p3578_p7, %p3577_p6 }
  0x14   :  { %p3580_p9 = pnand %p3579_p8, %p3573_p5 }
  0x16   :  { %3583 = shalt.err (!%p3580_p9)
}
  0x17   :  { %s3612_s7 = smov 512   ;;  %s3613_s8 = smov 32  }
  0x18   :  { %28 = dma.hbm_to_vmem [thread:$0]  %s3803_s2, 2048, %s23_s29, [#allocation3], %s3612_s7, %s3612_s7, %s3613_s8  }
  0x19   :  { %s3614_s11 = smov [#allocation6]  }
  0x1a   :  { %s46_s12 = sshll.u32 %s3614_s11, 4  ;;  %s47_s12 = int_to_ptr.vmem [resolvable:$true] %s46_s12 }
  0x1b   :  { %s3592_s3 = scalar_lea.vmem %s47_s12, 6144  ;;  %p3597_p11 = scmp.lt.s32.totalorder %s47_s12, %s47_s12 }
  0x1c   :  { %p3593_p10 = scmp.ne.s32.totalorder %s47_s12, %s3592_s3  ;;  %p3598_p12 = scmp.lt.s32.totalorder %s3592_s3, %s3592_s3 }
  0x1e   :  { %p3599_p13 = por %p3598_p12, %p3597_p11 }
  0x20   :  { %p3600_p0 = pnand %p3599_p13, %p3593_p10 }
  0x22   :  { %3603 = shalt.err (!%p3600_p0)
}
  0x23   :  { %s3615_s13 = smov 64   ;;  %s3616_s14 = smov 4  }
  0x24   :  { %52 = dma.hbm_to_vmem [thread:$0]  %s3805_s4, 6144, %s47_s12, [#allocation5], %s3615_s13, %s3615_s13, %s3616_s14  }
  0x25   :  { %3604 = dma.done.wait [#allocation3], 2048  }
  0x26   :  { %3605 = vsyncadd [#allocation3], 4294965248 }
  0x27   :  { %3606 = dma.done.wait [#allocation5], 30720  }
  0x28   :  { %3607 = vsyncadd [#allocation5], 4294936576  ;;  %v3617_v0 = vmov 0   ;;  %v79_v1 = vld [vmem:[#allocation2 + $0x40] sm:$0xff]  ;;  %v80_v3 = vld [vmem:[#allocation2 + $0x48] sm:$0xff]  ;;  %vm127_vm0 = vcmask 130048  }
  0x29   :  { %163 = vmatprep.mubr.bf16.mxu0 %v3617_v0  ;;  %204 = vmatprep.mubr.bf16.mxu1 %v3617_v0  ;;  %v83_v2 = vld [vmem:[#allocation2 + $0x60] sm:$0xff]  ;;  %v84_v5 = vld [vmem:[#allocation2 + $0x68] sm:$0xff]  ;;  %v81_v7 = vld [vmem:[#allocation2 + $0x50] sm:$0xff]  ;;  %vm3619_vm1 = vmmov 0  }
  0x2a   :  { %v2774_v4 = vcombine.high %v79_v1, %v83_v2  ;;  %v2773_v6 = vcombine.low %v79_v1, %v83_v2  ;;  %v2776_v8 = vcombine.high %v80_v3, %v84_v5  ;;  %v2775_v9 = vcombine.low %v80_v3, %v84_v5  ;;  %v85_v10 = vld [vmem:[#allocation2 + $0x70] sm:$0xff]  ;;  %v82_v11 = vld [vmem:[#allocation2 + $0x58] sm:$0xff]  ;;  %v71_v15 = vld [vmem:[#allocation2] sm:$0xff] }
  0x2b   :  { %v86_v12 = vld [vmem:[#allocation2 + $0x78] sm:$0xff]  ;;  %v2778_v13 = vcombine.high %v81_v7, %v85_v10  ;;  %v75_v16 = vld [vmem:[#allocation2 + $0x20] sm:$0xff]  ;;  %v2777_v18 = vcombine.low %v81_v7, %v85_v10  ;;  %v72_v19 = vld [vmem:[#allocation2 + $0x8] sm:$0xff] }
  0x2c   :  { %145 = vmatprep.subr.bf16.mxu0 %v2774_v4  ;;  %v2780_v14 = vcombine.high %v82_v11, %v86_v12  ;;  %186 = vmatprep.subr.bf16.mxu1 %v2776_v8  ;;  %v66_v17 = vld [vmem:[%s3802_s1] sm:$0xf]  ;;  %v76_v20 = vld [vmem:[#allocation2 + $0x28] sm:$0xff]  ;;  %v2779_v21 = vcombine.low %v82_v11, %v86_v12  ;;  %v2786_v22 = vcombine.high %v71_v15, %v75_v16  ;;  %v73_v24 = vld [vmem:[#allocation2 + $0x10] sm:$0xff] }
  0x2d   :  { %146 = vmatpush1.bf16.msra.mxu0 %v2773_v6  ;;  %187 = vmatpush1.bf16.msra.mxu1 %v2775_v9  ;;  %v2788_v23 = vcombine.high %v72_v19, %v76_v20  ;;  %v77_v25 = vld [vmem:[#allocation2 + $0x30] sm:$0xff]  ;;  %v2785_v26 = vcombine.low %v71_v15, %v75_v16  ;;  %v74_v27 = vld [vmem:[#allocation2 + $0x18] sm:$0xff]  ;;  %v2787_v29 = vcombine.low %v72_v19, %v76_v20  ;;  %v65_v32 = vld [vmem:[%s3801_s0] sm:$0xf] }
  0x2e   :  { %227 = vmatprep.subr.bf16.mxu0 %v2778_v13  ;;  %268 = vmatprep.subr.bf16.mxu1 %v2780_v14  ;;  %v78_v28 = vld [vmem:[#allocation2 + $0x38] sm:$0xff]  ;;  %v2790_v30 = vcombine.high %v73_v24, %v77_v25  ;;  %v2789_v33 = vcombine.low %v73_v24, %v77_v25  ;;  %v3240_v37 = vld [vmem:[#allocation4 + $0xa8] ss:$12 sps:$4 sm:$0xff]   ;;  %v3260_v47 = vld [vmem:[#allocation4 + $0x64] ss:$12 sps:$4 sm:$0xff]   ;;  %v503_v25 = vlaneseq }
  0x2f   :  { %v2792_v31 = vcombine.high %v74_v27, %v78_v28  ;;  %v2791_v34 = vcombine.low %v74_v27, %v78_v28  ;;  %v3242_v35 = vld [vmem:[#allocation4 + $0xac] ss:$12 sps:$4 sm:$0xff]   ;;  %v3243_v38 = vld [vmem:[#allocation4 + $0x228] ss:$12 sps:$4 sm:$0xff]   ;;  %v3246_v40 = vld [vmem:[#allocation4 + $0x90] ss:$12 sps:$4 sm:$0xff]  }
  0x30   :  { %2781 = vmatmul.mubr.msk.bf16.vlgmr.msra.gmra.mxu0 %vm127_vm0, %v66_v17  ;;  %2782 = vmatmul.mubr.msk.bf16.vlgmr.msra.gmra.mxu1 %vm127_vm0, %v66_v17  ;;  %v3245_v36 = vld [vmem:[#allocation4 + $0x22c] ss:$12 sps:$4 sm:$0xff]   ;;  %v3248_v39 = vld [vmem:[#allocation4 + $0x94] ss:$12 sps:$4 sm:$0xff]   ;;  %v3249_v42 = vld [vmem:[#allocation4 + $0x210] ss:$12 sps:$4 sm:$0xff]  }
  0x31   :  { %228 = vmatpush1.bf16.msra.mxu0 %v2777_v18  ;;  %269 = vmatpush1.bf16.msra.mxu1 %v2779_v21  ;;  %v3251_v41 = vld [vmem:[#allocation4 + $0x214] ss:$12 sps:$4 sm:$0xff]   ;;  %v3254_v43 = vld [vmem:[#allocation4 + $0x7c] ss:$12 sps:$4 sm:$0xff]   ;;  %v3252_v45 = vld [vmem:[#allocation4 + $0x78] ss:$12 sps:$4 sm:$0xff]  }
  0x32   :  { %245 = vmatprep.mubr.bf16.mxu0 %v3617_v0  ;;  %286 = vmatprep.mubr.bf16.mxu1 %v3617_v0  ;;  %v3257_v44 = vld [vmem:[#allocation4 + $0x1fc] ss:$12 sps:$4 sm:$0xff]   ;;  %v3255_v46 = vld [vmem:[#allocation4 + $0x1f8] ss:$12 sps:$4 sm:$0xff]   ;;  %v3258_v49 = vld [vmem:[#allocation4 + $0x60] ss:$12 sps:$4 sm:$0xff]  }
  0x33   :  { %352 = vmatprep.subr.bf16.mxu0 %v2786_v22  ;;  %393 = vmatprep.subr.bf16.mxu1 %v2788_v23  ;;  %v3263_v48 = vld [vmem:[#allocation4 + $0x1e4] ss:$12 sps:$4 sm:$0xff]   ;;  %v3261_v50 = vld [vmem:[#allocation4 + $0x1e0] ss:$12 sps:$4 sm:$0xff]   ;;  %v3264_v53 = vld [vmem:[#allocation4 + $0x48] ss:$12 sps:$4 sm:$0xff]  }
  0x34   :  { %v3266_v51 = vld [vmem:[#allocation4 + $0x4c] ss:$12 sps:$4 sm:$0xff]   ;;  %v3267_v54 = vld [vmem:[#allocation4 + $0x1c8] ss:$12 sps:$4 sm:$0xff]   ;;  %v3270_v57 = vld [vmem:[#allocation4 + $0x30] ss:$12 sps:$4 sm:$0xff]  }
  0x35   :  { %v3269_v52 = vld [vmem:[#allocation4 + $0x1cc] ss:$12 sps:$4 sm:$0xff]   ;;  %v3272_v55 = vld [vmem:[#allocation4 + $0x34] ss:$12 sps:$4 sm:$0xff]   ;;  %v3273_v58 = vld [vmem:[#allocation4 + $0x1b0] ss:$12 sps:$4 sm:$0xff]  }
  0x36   :  { %v3275_v56 = vld [vmem:[#allocation4 + $0x1b4] ss:$12 sps:$4 sm:$0xff]   ;;  %v3278_v59 = vld [vmem:[#allocation4 + $0x1c] ss:$12 sps:$4 sm:$0xff]   ;;  %v3276_v61 = vld [vmem:[#allocation4 + $0x18] ss:$12 sps:$4 sm:$0xff]  }
  0x37   :  { %v3281_v60 = vld [vmem:[#allocation4 + $0x19c] ss:$12 sps:$4 sm:$0xff]   ;;  %v3279_v62 = vld [vmem:[#allocation4 + $0x198] ss:$12 sps:$4 sm:$0xff]   ;;  %v3282_v1 = vld [vmem:[#allocation4] ss:$12 sps:$4 sm:$0xff]  }
  0x38   :  { %2783 = vmatmul.mubr.msk.bf16.vlgmr.msra.gmra.mxu0 %vm127_vm0, %v66_v17  ;;  %2784 = vmatmul.mubr.msk.bf16.vlgmr.msra.gmra.mxu1 %vm127_vm0, %v66_v17  ;;  %v3284_v63 = vld [vmem:[#allocation4 + $0x4] ss:$12 sps:$4 sm:$0xff]   ;;  %v3285_v2 = vld [vmem:[#allocation4 + $0x180] ss:$12 sps:$4 sm:$0xff]   ;;  %v3288_v5 = vld [vmem:[#allocation4 + $0x168] ss:$12 sps:$4 sm:$0xff]  }
  0x39   :  { %353 = vmatpush1.bf16.msra.mxu0 %v2785_v26  ;;  %394 = vmatpush1.bf16.msra.mxu1 %v2787_v29  ;;  %v3290_v3 = vld [vmem:[#allocation4 + $0x16c] ss:$12 sps:$4 sm:$0xff]   ;;  %v3291_v6 = vld [vmem:[#allocation4 + $0x2e8] ss:$12 sps:$4 sm:$0xff]   ;;  %v3294_v9 = vld [vmem:[#allocation4 + $0x150] ss:$12 sps:$4 sm:$0xff]  }
  0x3a   :  { %370 = vmatprep.mubr.bf16.mxu0 %v3617_v0  ;;  %411 = vmatprep.mubr.bf16.mxu1 %v3617_v0  ;;  %v3293_v4 = vld [vmem:[#allocation4 + $0x2ec] ss:$12 sps:$4 sm:$0xff]   ;;  %v3296_v7 = vld [vmem:[#allocation4 + $0x154] ss:$12 sps:$4 sm:$0xff]   ;;  %v3297_v10 = vld [vmem:[#allocation4 + $0x2d0] ss:$12 sps:$4 sm:$0xff]  }
  0x3b   :  { %434 = vmatprep.subr.bf16.mxu0 %v2790_v30  ;;  %475 = vmatprep.subr.bf16.mxu1 %v2792_v31  ;;  %v3299_v8 = vld [vmem:[#allocation4 + $0x2d4] ss:$12 sps:$4 sm:$0xff]   ;;  %v3302_v11 = vld [vmem:[#allocation4 + $0x13c] ss:$12 sps:$4 sm:$0xff]   ;;  %v3300_v13 = vld [vmem:[#allocation4 + $0x138] ss:$12 sps:$4 sm:$0xff]  }
  0x3c   :  { %v3305_v12 = vld [vmem:[#allocation4 + $0x2bc] ss:$12 sps:$4 sm:$0xff]   ;;  %v3303_v14 = vld [vmem:[#allocation4 + $0x2b8] ss:$12 sps:$4 sm:$0xff]   ;;  %v3306_v17 = vld [vmem:[#allocation4 + $0x120] ss:$12 sps:$4 sm:$0xff]  }
  0x3d   :  { %v3308_v15 = vld [vmem:[#allocation4 + $0x124] ss:$12 sps:$4 sm:$0xff]   ;;  %v3309_v18 = vld [vmem:[#allocation4 + $0x2a0] ss:$12 sps:$4 sm:$0xff]   ;;  %v3312_v21 = vld [vmem:[#allocation4 + $0x108] ss:$12 sps:$4 sm:$0xff]  }
  0x3e   :  { %v3311_v16 = vld [vmem:[#allocation4 + $0x2a4] ss:$12 sps:$4 sm:$0xff]   ;;  %v3314_v19 = vld [vmem:[#allocation4 + $0x10c] ss:$12 sps:$4 sm:$0xff]   ;;  %v3315_v22 = vld [vmem:[#allocation4 + $0x288] ss:$12 sps:$4 sm:$0xff]  }
  0x3f   :  { %v3317_v20 = vld [vmem:[#allocation4 + $0x28c] ss:$12 sps:$4 sm:$0xff]   ;;  %v3320_v23 = vld [vmem:[#allocation4 + $0xf4] ss:$12 sps:$4 sm:$0xff]   ;;  %v3318_v26 = vld [vmem:[#allocation4 + $0xf0] ss:$12 sps:$4 sm:$0xff]  }
  0x40   :  { %2793 = vmatmul.mubr.msk.bf16.vlgmr.msra.gmra.mxu0 %vm127_vm0, %v65_v32  ;;  %2794 = vmatmul.mubr.msk.bf16.vlgmr.msra.gmra.mxu1 %vm127_vm0, %v65_v32  ;;  %v3323_v24 = vld [vmem:[#allocation4 + $0x274] ss:$12 sps:$4 sm:$0xff]   ;;  %v3321_v27 = vld [vmem:[#allocation4 + $0x270] ss:$12 sps:$4 sm:$0xff]   ;;  %v3686_v28 = vshrl.u32 %v503_v25, 7 }
  0x41   :  { %435 = vmatpush1.bf16.msra.mxu0 %v2789_v33  ;;  %476 = vmatpush1.bf16.msra.mxu1 %v2791_v34  ;;  %v3326_v29 = vld [vmem:[#allocation4 + $0xdc] ss:$12 sps:$4 sm:$0xff]   ;;  %v3324_v31 = vld [vmem:[#allocation4 + $0xd8] ss:$12 sps:$4 sm:$0xff]  }
  0x42   :  { %452 = vmatprep.mubr.bf16.mxu0 %v3617_v0  ;;  %493 = vmatprep.mubr.bf16.mxu1 %v3617_v0  ;;  %v3287_v0 = vld [vmem:[#allocation4 + $0x184] ss:$12 sps:$4 sm:$0xff]   ;;  %v3329_v30 = vld [vmem:[#allocation4 + $0x25c] ss:$12 sps:$4 sm:$0xff]  }
  0x43   :  { %1223 = vmatprep.subr.bf16.mxu0 %v3242_v35  ;;  %1264 = vmatprep.subr.bf16.mxu1 %v3245_v36  ;;  %v3332_v33 = vld [vmem:[#allocation4 + $0xc4] ss:$12 sps:$4 sm:$0xff]   ;;  %v3330_v36 = vld [vmem:[#allocation4 + $0xc0] ss:$12 sps:$4 sm:$0xff]  }
  0x44   :  { %v3335_v34 = vld [vmem:[#allocation4 + $0x244] ss:$12 sps:$4 sm:$0xff]  }
  0x45   :  { %v3691_v35 = vld [vmem:[%s3806_s5] sm:$0xff] }
  0x48   :  { %2795 = vmatmul.mubr.msk.bf16.vlgmr.msra.gmra.mxu0 %vm127_vm0, %v65_v32  ;;  %2796 = vmatmul.mubr.msk.bf16.vlgmr.msra.gmra.mxu1 %vm127_vm0, %v65_v32  ;;  %v3327_v32 = vld [vmem:[#allocation4 + $0x258] ss:$12 sps:$4 sm:$0xff]  }
  0x49   :  { %1224 = vmatpush1.bf16.msra.mxu0 %v3240_v37  ;;  %1265 = vmatpush1.bf16.msra.mxu1 %v3243_v38  ;;  %v3333_v37 = vld [vmem:[#allocation4 + $0x240] ss:$12 sps:$4 sm:$0xff]   ;;  %v521_v38 = vsub.s32 4, %v3686_v28 }
  0x4a   :  { %1225 = vmatprep.subr.bf16.mxu0 %v3248_v39  ;;  %1266 = vmatprep.subr.bf16.mxu1 %v3251_v41  ;;  %v529_v39 = vsub.s32 6, %v3686_v28 }
  0x4c   :  { %v3697_v41 = vrot.slane %v3691_v35, %v529_v39  ;;  %v3340_v39 = vld [vmem:[#allocation4 + $0x158] ss:$12 sps:$4 sm:$0xff]  }
  0x4d   :  { %1226 = vmatpush1.bf16.msra.mxu0 %v3246_v40  ;;  %1267 = vmatpush1.bf16.msra.mxu1 %v3249_v42  ;;  %v522_v40 = vrot.slane %v3691_v35, %v521_v38  ;;  %v3336_v42 = vld [vmem:[#allocation4 + $0x170] ss:$12 sps:$4 sm:$0xff]  }
  0x4e   :  { %1227 = vmatprep.subr.bf16.mxu0 %v3254_v43  ;;  %1268 = vmatprep.subr.bf16.mxu1 %v3257_v44  ;;  %v3337_v43 = vld [vmem:[#allocation4 + $0x2f0] ss:$12 sps:$4 sm:$0xff]  }
  0x51   :  { %1228 = vmatpush1.bf16.msra.mxu0 %v3252_v45  ;;  %1269 = vmatpush1.bf16.msra.mxu1 %v3255_v46 }
  0x52   :  { %1229 = vmatprep.subr.bf16.mxu0 %v3260_v47  ;;  %1270 = vmatprep.subr.bf16.mxu1 %v3263_v48 }
  0x55   :  { %1230 = vmatpush1.bf16.msra.mxu0 %v3258_v49  ;;  %1271 = vmatpush1.bf16.msra.mxu1 %v3261_v50 }
  0x56   :  { %1231 = vmatprep.subr.bf16.mxu0 %v3266_v51  ;;  %1272 = vmatprep.subr.bf16.mxu1 %v3269_v52 }
  0x59   :  { %1232 = vmatpush1.bf16.msra.mxu0 %v3264_v53  ;;  %1273 = vmatpush1.bf16.msra.mxu1 %v3267_v54 }
  0x5a   :  { %1233 = vmatprep.subr.bf16.mxu0 %v3272_v55  ;;  %1274 = vmatprep.subr.bf16.mxu1 %v3275_v56  ;;  %v3704_v56 = vsub.s32 0, %v3686_v28 }
  0x5d   :  { %1234 = vmatpush1.bf16.msra.mxu0 %v3270_v57  ;;  %1275 = vmatpush1.bf16.msra.mxu1 %v3273_v58  ;;  %v3707_v58 = vsub.s32 2, %v3686_v28 }
  0x5e   :  { %1235 = vmatprep.subr.bf16.mxu0 %v3278_v59  ;;  %1276 = vmatprep.subr.bf16.mxu1 %v3281_v60  ;;  %v3710_v60 = vsub.s32 1, %v3686_v28 }
  0x61   :  { %1236 = vmatpush1.bf16.msra.mxu0 %v3276_v61  ;;  %1277 = vmatpush1.bf16.msra.mxu1 %v3279_v62  ;;  %v517_v62 = vsub.s32 3, %v3686_v28 }
  0x62   :  { %1237 = vmatprep.subr.bf16.mxu0 %v3284_v63  ;;  %1278 = vmatprep.subr.bf16.mxu1 %v3287_v0  ;;  %v506_v0 = vrot.slane %v3691_v35, %v3704_v56 }
  0x65   :  { %1238 = vmatpush1.bf16.msra.mxu0 %v3282_v1  ;;  %1279 = vmatpush1.bf16.msra.mxu1 %v3285_v2  ;;  %v514_v2 = vrot.slane %v3691_v35, %v3707_v58 }
  0x66   :  { %1239 = vmatprep.subr.bf16.mxu0 %v3290_v3  ;;  %1280 = vmatprep.subr.bf16.mxu1 %v3293_v4 }
  0x69   :  { %1240 = vmatpush2.bf16.msra.mxu0 %v3288_v5  ;;  %1281 = vmatpush2.bf16.msra.mxu1 %v3291_v6  ;;  %v510_v5 = vrot.slane %v3691_v35, %v3710_v60 }
  0x6a   :  { %1241 = vmatprep.subr.bf16.mxu0 %v3296_v7  ;;  %1282 = vmatprep.subr.bf16.mxu1 %v3299_v8  ;;  %v518_v8 = vrot.slane %v3691_v35, %v517_v62  ;;  %v3353_v62 = vld [vmem:[#allocation4 + $0x290] ss:$12 sps:$4 sm:$0xff]  }
  0x6d   :  { %1242 = vmatpush2.bf16.msra.mxu0 %v3294_v9  ;;  %1283 = vmatpush2.bf16.msra.mxu1 %v3297_v10 }
  0x6e   :  { %1243 = vmatprep.subr.bf16.mxu0 %v3302_v11  ;;  %1284 = vmatprep.subr.bf16.mxu1 %v3305_v12 }
  0x71   :  { %1244 = vmatpush2.bf16.msra.mxu0 %v3300_v13  ;;  %1285 = vmatpush2.bf16.msra.mxu1 %v3303_v14 }
  0x72   :  { %1245 = vmatprep.subr.bf16.mxu0 %v3308_v15  ;;  %1286 = vmatprep.subr.bf16.mxu1 %v3311_v16 }
  0x75   :  { %1246 = vmatpush2.bf16.msra.mxu0 %v3306_v17  ;;  %1287 = vmatpush2.bf16.msra.mxu1 %v3309_v18 }
  0x76   :  { %1247 = vmatprep.subr.bf16.mxu0 %v3314_v19  ;;  %1288 = vmatprep.subr.bf16.mxu1 %v3317_v20 }
  0x79   :  { %1248 = vmatpush2.bf16.msra.mxu0 %v3312_v21  ;;  %1289 = vmatpush2.bf16.msra.mxu1 %v3315_v22 }
  0x7a   :  { %1249 = vmatprep.subr.bf16.mxu0 %v3320_v23  ;;  %1290 = vmatprep.subr.bf16.mxu1 %v3323_v24 }
  0x7d   :  { %1250 = vmatpush2.bf16.msra.mxu0 %v3318_v26  ;;  %1291 = vmatpush2.bf16.msra.mxu1 %v3321_v27 }
  0x7e   :  { %1251 = vmatprep.subr.bf16.mxu0 %v3326_v29  ;;  %1292 = vmatprep.subr.bf16.mxu1 %v3329_v30  ;;  %v3338_v29 = vld [vmem:[#allocation4 + $0xb0] ss:$12 sps:$4 sm:$0xff]  }
  0x81   :  { %1252 = vmatpush2.bf16.msra.mxu0 %v3324_v31  ;;  %1293 = vmatpush2.bf16.msra.mxu1 %v3327_v32 }
  0x82   :  { %1253 = vmatprep.subr.bf16.mxu0 %v3332_v33  ;;  %1294 = vmatprep.subr.bf16.mxu1 %v3335_v34  ;;  %v3339_v34 = vld [vmem:[#allocation4 + $0x230] ss:$12 sps:$4 sm:$0xff]  }
  0x85   :  { %1254 = vmatpush2.bf16.msra.mxu0 %v3330_v36  ;;  %1295 = vmatpush2.bf16.msra.mxu1 %v3333_v37 }
  0x86   :  { %3038 = vmatprep.subr.bf16.mxu0 %v3336_v42  ;;  %3060 = vmatprep.subr.bf16.mxu1 %v3337_v43  ;;  %v3341_v43 = vld [vmem:[#allocation4 + $0x2d8] ss:$12 sps:$4 sm:$0xff]  }
  0xf0   :  { %v165_v44 = vpop.f32.mrf.mxu0  ;;  %v206_v45 = vpop.f32.mrf.mxu1 }
  0xf2   :  { %v167_v46 = vpop.f32.mrf.mxu0  ;;  %v208_v47 = vpop.f32.mrf.mxu1 }
  0xf4   :  { %v169_v48 = vpop.f32.mrf.mxu0  ;;  %v210_v49 = vpop.f32.mrf.mxu1 }
  0xf5   :  { %v3345_v49 = vld [vmem:[#allocation4 + $0x2c0] ss:$12 sps:$4 sm:$0xff]  }
  0xf6   :  { %v170_v50 = vpop.f32.mrf.mxu0  ;;  %v211_v51 = vpop.f32.mrf.mxu1 }
  0xf7   :  { %v3346_v50 = vld [vmem:[#allocation4 + $0x80] ss:$12 sps:$4 sm:$0xff]  }
  0xf8   :  { %v247_v52 = vpop.f32.mrf.mxu0  ;;  %v288_v53 = vpop.f32.mrf.mxu1  ;;  %v3347_v51 = vld [vmem:[#allocation4 + $0x200] ss:$12 sps:$4 sm:$0xff]  }
  0xfa   :  { %v3699_v54 = vpop.f32.mrf.mxu0  ;;  %v3701_v55 = vpop.f32.mrf.mxu1 }
  0xfc   :  { %v251_v57 = vpop.f32.mrf.mxu0  ;;  %v292_v59 = vpop.f32.mrf.mxu1 }
  0xfd   :  { %v3350_v57 = vld [vmem:[#allocation4 + $0x68] ss:$12 sps:$4 sm:$0xff]  }
  0xfe   :  { %v252_v61 = vpop.f32.mrf.mxu0  ;;  %v293_v63 = vpop.f32.mrf.mxu1  ;;  %v3351_v59 = vld [vmem:[#allocation4 + $0x1e8] ss:$12 sps:$4 sm:$0xff]  }
  0xff   :  { %v3352_v61 = vld [vmem:[#allocation4 + $0x110] ss:$12 sps:$4 sm:$0xff]  }
 0x100   :  { %v372_v1 = vpop.f32.mrf.mxu0  ;;  %v413_v4 = vpop.f32.mrf.mxu1  ;;  %v3354_v63 = vld [vmem:[#allocation4 + $0x50] ss:$12 sps:$4 sm:$0xff]  }
 0x101   :  { %v373_v3 = vadd.f32 %v372_v1, %v165_v44  ;;  %v414_v6 = vadd.f32 %v413_v4, %v206_v45  ;;  %v3342_v45 = vld [vmem:[#allocation4 + $0x98] ss:$12 sps:$4 sm:$0xff]   ;;  %v533_v4 = vsub.s32 7, %v3686_v28 }
 0x102   :  { %v374_v7 = vpop.f32.mrf.mxu0  ;;  %v415_v11 = vpop.f32.mrf.mxu1  ;;  %v3356_v1 = vld [vmem:[#allocation4 + $0xf8] ss:$12 sps:$4 sm:$0xff]  }
 0x103   :  { %v543_v9 = vadd.f32 %v506_v0, %v373_v3  ;;  %v375_v10 = vadd.f32 %v374_v7, %v167_v46  ;;  %v545_v12 = vadd.f32 %v514_v2, %v414_v6  ;;  %v416_v13 = vadd.f32 %v415_v11, %v208_v47  ;;  %v3344_v47 = vld [vmem:[#allocation4 + $0x140] ss:$12 sps:$4 sm:$0xff]   ;;  %v3355_v0 = vld [vmem:[#allocation4 + $0x1d0] ss:$12 sps:$4 sm:$0xff]   ;;  %v3357_v2 = vld [vmem:[#allocation4 + $0x278] ss:$12 sps:$4 sm:$0xff]  }
 0x104   :  { %v376_v14 = vpop.f32.mrf.mxu0  ;;  %v417_v16 = vpop.f32.mrf.mxu1  ;;  %v525_v3 = vsub.s32 5, %v3686_v28  ;;  %v3359_v6 = vld [vmem:[#allocation4 + $0x1b8] ss:$12 sps:$4 sm:$0xff]   ;;  %v3360_v7 = vld [vmem:[#allocation4 + $0xe0] ss:$12 sps:$4 sm:$0xff]  }
 0x105   :  { %v544_v15 = vadd.f32 %v510_v5, %v375_v10  ;;  %v551_v17 = vmax.f32 %v543_v9, 0.0  ;;  %v546_v18 = vadd.f32 %v518_v8, %v416_v13  ;;  %v553_v20 = vmax.f32 %v545_v12, 0.0  ;;  %v3358_v5 = vld [vmem:[#allocation4 + $0x38] ss:$12 sps:$4 sm:$0xff]   ;;  %v3361_v8 = vld [vmem:[#allocation4 + $0x260] ss:$12 sps:$4 sm:$0xff]  }
 0x106   :  { %v377_v19 = vpop.f32.mrf.mxu0  ;;  %v418_v22 = vpop.f32.mrf.mxu1  ;;  %v526_v10 = vrot.slane %v3691_v35, %v525_v3  ;;  %v534_v12 = vrot.slane %v3691_v35, %v533_v4  ;;  %v3362_v13 = vld [vmem:[#allocation4 + $0x20] ss:$12 sps:$4 sm:$0xff]   ;;  %v3364_v14 = vld [vmem:[#allocation4 + $0xc8] ss:$12 sps:$4 sm:$0xff]   ;;  %v3422_v4 = vld [vmem:[#allocation4 + $0x450] ss:$12 sps:$4 sm:$0xff]  }
 0x107   :  { %v552_v21 = vmax.f32 %v544_v15, 0.0  ;;  %v554_v23 = vmax.f32 %v546_v18, 0.0  ;;  %v3720_v30 = vpack.c.bf16 %v551_v17, %v551_v17  ;;  %v3722_v36 = vpack.c.bf16 %v553_v20, %v553_v20  ;;  %v3363_v28 = vld [vmem:[#allocation4 + $0x1a0] ss:$12 sps:$4 sm:$0xff]   ;;  %v3365_v15 = vld [vmem:[#allocation4 + $0x248] ss:$12 sps:$4 sm:$0xff]  }
 0x108   :  { %v454_v24 = vpop.f32.mrf.mxu0  ;;  %v495_v27 = vpop.f32.mrf.mxu1  ;;  %v3366_v18 = vld [vmem:[#allocation4 + $0x8] ss:$12 sps:$4 sm:$0xff]   ;;  %v3370_v19 = vld [vmem:[#allocation4 + $0x3ac] ss:$12 sps:$4 sm:$0xff]  }
 0x109   :  { %v560_v25 = vpack.c.bf16 %v552_v21, %v552_v21  ;;  %v455_v26 = vadd.f32 %v454_v24, %v247_v52  ;;  %v562_v31 = vpack.c.bf16 %v554_v23, %v554_v23  ;;  %v496_v32 = vadd.f32 %v495_v27, %v288_v53  ;;  %v3348_v52 = vld [vmem:[#allocation4 + $0x128] ss:$12 sps:$4 sm:$0xff]   ;;  %v3374_v27 = vld [vmem:[#allocation4 + $0x390] ss:$12 sps:$4 sm:$0xff]  }
 0x10a   :  { %v456_v33 = vpop.f32.mrf.mxu0  ;;  %v497_v38 = vpop.f32.mrf.mxu1  ;;  %v3349_v53 = vld [vmem:[#allocation4 + $0x2a8] ss:$12 sps:$4 sm:$0xff]  }
 0x10b   :  { %v3724_v37 = vadd.f32 %v522_v40, %v455_v26  ;;  %1255 = vmatprep.mubr.bf16.mxu0 %v560_v25  ;;  %v3727_v42 = vadd.f32 %v3697_v41, %v496_v32  ;;  %1296 = vmatprep.mubr.bf16.mxu1 %v562_v31  ;;  %v3343_v40 = vld [vmem:[#allocation4 + $0x218] ss:$12 sps:$4 sm:$0xff]   ;;  %v457_v9 = vadd.f32 %v456_v33, %v3699_v54  ;;  %v3367_v54 = vld [vmem:[#allocation4 + $0x188] ss:$12 sps:$4 sm:$0xff]  }
 0x10c   :  { %1256 = vmatmul.mubr.bf16.vlgmr.msra.gmra.mxu0 %v3720_v30  ;;  %v458_v44 = vpop.f32.mrf.mxu0  ;;  %1297 = vmatmul.mubr.bf16.vlgmr.msra.gmra.mxu1 %v3722_v36  ;;  %v499_v46 = vpop.f32.mrf.mxu1  ;;  %v498_v11 = vadd.f32 %v497_v38, %v3701_v55  ;;  %v3373_v55 = vld [vmem:[#allocation4 + $0x52c] ss:$12 sps:$4 sm:$0xff]   ;;  %v3368_v21 = vld [vmem:[#allocation4 + $0x3a8] ss:$12 sps:$4 sm:$0xff]  }
 0x10d   :  { %3039 = vmatpush3.bf16.msra.mxu0 %v3338_v29  ;;  %3061 = vmatpush3.bf16.msra.mxu1 %v3339_v34  ;;  %v548_v16 = vadd.f32 %v526_v10, %v457_v9  ;;  %v3371_v22 = vld [vmem:[#allocation4 + $0x528] ss:$12 sps:$4 sm:$0xff]   ;;  %v3377_v29 = vld [vmem:[#allocation4 + $0x510] ss:$12 sps:$4 sm:$0xff]   ;;  %v3380_v33 = vld [vmem:[#allocation4 + $0x378] ss:$12 sps:$4 sm:$0xff]  }
 0x10e   :  { %1337 = vmatprep.mubr.bf16.mxu0 %v560_v25  ;;  %v459_v48 = vpop.f32.mrf.mxu0  ;;  %1377 = vmatprep.mubr.bf16.mxu1 %v562_v31  ;;  %v500_v41 = vpop.f32.mrf.mxu1  ;;  %v550_v17 = vadd.f32 %v534_v12, %v498_v11  ;;  %v3376_v23 = vld [vmem:[#allocation4 + $0x394] ss:$12 sps:$4 sm:$0xff]   ;;  %v3382_v31 = vld [vmem:[#allocation4 + $0x37c] ss:$12 sps:$4 sm:$0xff]   ;;  %v3388_v34 = vld [vmem:[#allocation4 + $0x364] ss:$12 sps:$4 sm:$0xff]  }
 0x10f   :  { %3040 = vmatprep.subr.bf16.mxu0 %v3340_v39  ;;  %3062 = vmatprep.subr.bf16.mxu1 %v3341_v43  ;;  %v556_v20 = vmax.f32 %v548_v16, 0.0  ;;  %v3379_v25 = vld [vmem:[#allocation4 + $0x514] ss:$12 sps:$4 sm:$0xff]   ;;  %v3385_v32 = vld [vmem:[#allocation4 + $0x4fc] ss:$12 sps:$4 sm:$0xff]  }
 0x110   :  { %v558_v35 = vmax.f32 %v550_v17, 0.0  ;;  %v3386_v38 = vld [vmem:[#allocation4 + $0x360] ss:$12 sps:$4 sm:$0xff]   ;;  %v3395_v46 = vld [vmem:[#allocation4 + $0x4c8] ss:$12 sps:$4 sm:$0xff]  }
 0x111   :  { %3041 = vmatpush3.bf16.msra.mxu0 %v3342_v45  ;;  %3063 = vmatpush3.bf16.msra.mxu1 %v3343_v40  ;;  %v3737_v24 = vpack.c.bf16 %v556_v20, %v556_v20  ;;  %v3389_v39 = vld [vmem:[#allocation4 + $0x4e0] ss:$12 sps:$4 sm:$0xff]   ;;  %v3392_v45 = vld [vmem:[#allocation4 + $0x348] ss:$12 sps:$4 sm:$0xff]   ;;  %v3398_v48 = vld [vmem:[#allocation4 + $0x330] ss:$12 sps:$4 sm:$0xff]  }
 0x112   :  { %3042 = vmatprep.subr.bf16.mxu0 %v3344_v47  ;;  %3064 = vmatprep.subr.bf16.mxu1 %v3345_v49  ;;  %v3740_v26 = vpack.c.bf16 %v558_v35, %v558_v35  ;;  %v3394_v43 = vld [vmem:[#allocation4 + $0x34c] ss:$12 sps:$4 sm:$0xff]   ;;  %v3400_v40 = vld [vmem:[#allocation4 + $0x334] ss:$12 sps:$4 sm:$0xff]   ;;  %v3401_v49 = vld [vmem:[#allocation4 + $0x4b0] ss:$12 sps:$4 sm:$0xff]  }
 0x113   :  { %v3397_v44 = vld [vmem:[#allocation4 + $0x4cc] ss:$12 sps:$4 sm:$0xff]   ;;  %v3403_v47 = vld [vmem:[#allocation4 + $0x4b4] ss:$12 sps:$4 sm:$0xff]   ;;  %v3406_v41 = vld [vmem:[#allocation4 + $0x31c] ss:$12 sps:$4 sm:$0xff]  }
 0x114   :  { %v3427_v3 = vld [vmem:[#allocation4 + $0x5d4] ss:$12 sps:$4 sm:$0xff]   ;;  %v3431_v9 = vld [vmem:[#allocation4 + $0x5b8] ss:$12 sps:$4 sm:$0xff]   ;;  %v3457_v20 = vld [vmem:[#allocation4 + $0x55c] ss:$12 sps:$4 sm:$0xff]  }
 0x115   :  { %3043 = vmatpush3.bf16.msra.mxu0 %v3346_v50  ;;  %3065 = vmatpush3.bf16.msra.mxu1 %v3347_v51  ;;  %v3409_v50 = vld [vmem:[#allocation4 + $0x49c] ss:$12 sps:$4 sm:$0xff]   ;;  %v3404_v51 = vld [vmem:[#allocation4 + $0x318] ss:$12 sps:$4 sm:$0xff]   ;;  %v3434_v12 = vld [vmem:[#allocation4 + $0x420] ss:$12 sps:$4 sm:$0xff]  }
 0x116   :  { %3044 = vmatprep.subr.bf16.mxu0 %v3348_v52  ;;  %3066 = vmatprep.subr.bf16.mxu1 %v3349_v53  ;;  %v3407_v52 = vld [vmem:[#allocation4 + $0x498] ss:$12 sps:$4 sm:$0xff]   ;;  %v3443_v16 = vld [vmem:[#allocation4 + $0x588] ss:$12 sps:$4 sm:$0xff]  }
 0x117   :  { %v3412_v53 = vld [vmem:[#allocation4 + $0x304] ss:$12 sps:$4 sm:$0xff]   ;;  %v3448_v17 = vld [vmem:[#allocation4 + $0x3f4] ss:$12 sps:$4 sm:$0xff]  }
 0x118   :  { %v3436_v10 = vld [vmem:[#allocation4 + $0x424] ss:$12 sps:$4 sm:$0xff]  }
 0x119   :  { %3045 = vmatpush3.bf16.msra.mxu0 %v3350_v57  ;;  %3067 = vmatpush3.bf16.msra.mxu1 %v3351_v59  ;;  %v3415_v57 = vld [vmem:[#allocation4 + $0x484] ss:$12 sps:$4 sm:$0xff]   ;;  %v3410_v59 = vld [vmem:[#allocation4 + $0x300] ss:$12 sps:$4 sm:$0xff]  }
 0x11a   :  { %3046 = vmatprep.subr.bf16.mxu0 %v3352_v61  ;;  %3068 = vmatprep.subr.bf16.mxu1 %v3353_v62  ;;  %v3413_v61 = vld [vmem:[#allocation4 + $0x480] ss:$12 sps:$4 sm:$0xff]   ;;  %v3439_v11 = vld [vmem:[#allocation4 + $0x5a4] ss:$12 sps:$4 sm:$0xff]  }
 0x11b   :  { %v3418_v62 = vld [vmem:[#allocation4 + $0x46c] ss:$12 sps:$4 sm:$0xff]  }
 0x11c   :  { %v3452_v35 = vld [vmem:[#allocation4 + $0x3d8] ss:$12 sps:$4 sm:$0xff]  }
 0x11d   :  { %3047 = vmatpush3.bf16.msra.mxu0 %v3354_v63  ;;  %3069 = vmatpush3.bf16.msra.mxu1 %v3355_v0  ;;  %v3421_v63 = vld [vmem:[#allocation4 + $0x5ec] ss:$12 sps:$4 sm:$0xff]   ;;  %v3416_v0 = vld [vmem:[#allocation4 + $0x468] ss:$12 sps:$4 sm:$0xff]  }
 0x11e   :  { %3048 = vmatprep.subr.bf16.mxu0 %v3356_v1  ;;  %3070 = vmatprep.subr.bf16.mxu1 %v3357_v2  ;;  %v3419_v1 = vld [vmem:[#allocation4 + $0x5e8] ss:$12 sps:$4 sm:$0xff]  }
 0x11f   :  { %v3424_v2 = vld [vmem:[#allocation4 + $0x454] ss:$12 sps:$4 sm:$0xff]  }
 0x121   :  { %3049 = vmatpush3.bf16.msra.mxu0 %v3358_v5  ;;  %3071 = vmatpush3.bf16.msra.mxu1 %v3359_v6  ;;  %v3425_v5 = vld [vmem:[#allocation4 + $0x5d0] ss:$12 sps:$4 sm:$0xff]  }
 0x122   :  { %3050 = vmatprep.subr.bf16.mxu0 %v3360_v7  ;;  %3072 = vmatprep.subr.bf16.mxu1 %v3361_v8  ;;  %v3430_v6 = vld [vmem:[#allocation4 + $0x43c] ss:$12 sps:$4 sm:$0xff]   ;;  %v3428_v8 = vld [vmem:[#allocation4 + $0x438] ss:$12 sps:$4 sm:$0xff]  }
 0x123   :  { %v3433_v7 = vld [vmem:[#allocation4 + $0x5bc] ss:$12 sps:$4 sm:$0xff]  }
 0x125   :  { %3051 = vmatpush3.bf16.msra.mxu0 %v3362_v13  ;;  %3073 = vmatpush3.bf16.msra.mxu1 %v3363_v28  ;;  %v3437_v13 = vld [vmem:[#allocation4 + $0x5a0] ss:$12 sps:$4 sm:$0xff]  }
 0x126   :  { %3052 = vmatprep.subr.bf16.mxu0 %v3364_v14  ;;  %3074 = vmatprep.subr.bf16.mxu1 %v3365_v15  ;;  %v3442_v28 = vld [vmem:[#allocation4 + $0x40c] ss:$12 sps:$4 sm:$0xff]   ;;  %v3440_v15 = vld [vmem:[#allocation4 + $0x408] ss:$12 sps:$4 sm:$0xff]  }
 0x127   :  { %v3445_v14 = vld [vmem:[#allocation4 + $0x58c] ss:$12 sps:$4 sm:$0xff]  }
 0x129   :  { %3053 = vmatpush3.bf16.msra.mxu0 %v3366_v18  ;;  %3075 = vmatpush3.bf16.msra.mxu1 %v3367_v54  ;;  %v3451_v18 = vld [vmem:[#allocation4 + $0x574] ss:$12 sps:$4 sm:$0xff]   ;;  %v3446_v54 = vld [vmem:[#allocation4 + $0x3f0] ss:$12 sps:$4 sm:$0xff]  }
 0x12a   :  { %2041 = vmatprep.subr.bf16.mxu0 %v3370_v19  ;;  %2082 = vmatprep.subr.bf16.mxu1 %v3373_v55  ;;  %v3449_v19 = vld [vmem:[#allocation4 + $0x570] ss:$12 sps:$4 sm:$0xff]  }
 0x12b   :  { %v3454_v55 = vld [vmem:[#allocation4 + $0x3dc] ss:$12 sps:$4 sm:$0xff]  }
 0x12c   :  { %1338 = vmatmul.mubr.bf16.vlgmr.msra.gmra.mxu0 %v3720_v30  ;;  %1378 = vmatmul.mubr.bf16.vlgmr.msra.gmra.mxu1 %v3722_v36  ;;  %v3383_v30 = vld [vmem:[#allocation4 + $0x4f8] ss:$12 sps:$4 sm:$0xff]  }
 0x12d   :  { %2042 = vmatpush1.bf16.msra.mxu0 %v3368_v21  ;;  %2073 = vmatprep.mubr.bf16.mxu0 %v3737_v24  ;;  %v3391_v36 = vld [vmem:[#allocation4 + $0x4e4] ss:$12 sps:$4 sm:$0xff]  }
 0x12e   :  { %2083 = vmatpush1.bf16.msra.mxu1 %v3371_v22  ;;  %2114 = vmatprep.mubr.bf16.mxu1 %v3740_v26  ;;  %v3455_v21 = vld [vmem:[#allocation4 + $0x558] ss:$12 sps:$4 sm:$0xff]  }
 0x12f   :  { %2043 = vmatprep.subr.bf16.mxu0 %v3376_v23  ;;  %2084 = vmatprep.subr.bf16.mxu1 %v3379_v25  ;;  %v3460_v22 = vld [vmem:[#allocation4 + $0x3c4] ss:$12 sps:$4 sm:$0xff]   ;;  %v3458_v25 = vld [vmem:[#allocation4 + $0x3c0] ss:$12 sps:$4 sm:$0xff]  }
 0x130   :  { %v3463_v23 = vld [vmem:[#allocation4 + $0x544] ss:$12 sps:$4 sm:$0xff]  }
 0x131   :  { %2044 = vmatpush1.bf16.msra.mxu0 %v3374_v27  ;;  %v555_v27 = vmax.f32 %v3724_v37, 0.0  ;;  %v3469_v37 = vld [vmem:[#allocation4 + $0x5d8] ss:$12 sps:$4 sm:$0xff]  }
 0x132   :  { %2085 = vmatpush1.bf16.msra.mxu1 %v3377_v29  ;;  %2045 = vmatprep.subr.bf16.mxu0 %v3382_v31  ;;  %v3461_v29 = vld [vmem:[#allocation4 + $0x540] ss:$12 sps:$4 sm:$0xff]   ;;  %v3464_v31 = vld [vmem:[#allocation4 + $0x470] ss:$12 sps:$4 sm:$0xff]  }
 0x133   :  { %2086 = vmatprep.subr.bf16.mxu1 %v3385_v32  ;;  %v557_v32 = vmax.f32 %v3727_v42, 0.0  ;;  %v3470_v42 = vld [vmem:[#allocation4 + $0x398] ss:$12 sps:$4 sm:$0xff]  }
 0x135   :  { %2046 = vmatpush1.bf16.msra.mxu0 %v3380_v33  ;;  %v3465_v33 = vld [vmem:[#allocation4 + $0x5f0] ss:$12 sps:$4 sm:$0xff]  }
 0x136   :  { %2087 = vmatpush1.bf16.msra.mxu1 %v3383_v30  ;;  %2047 = vmatprep.subr.bf16.mxu0 %v3388_v34  ;;  %v3466_v30 = vld [vmem:[#allocation4 + $0x3b0] ss:$12 sps:$4 sm:$0xff]   ;;  %v3747_v34 = vpack.c.bf16 %v555_v27, %v555_v27 }
 0x137   :  { %2088 = vmatprep.subr.bf16.mxu1 %v3391_v36  ;;  %v3467_v36 = vld [vmem:[#allocation4 + $0x530] ss:$12 sps:$4 sm:$0xff]  }
 0x138   :  { %v3526_v27 = vld [vmem:[#allocation6 + $0x158] sm:$0xff]  }
 0x139   :  { %2048 = vmatpush1.bf16.msra.mxu0 %v3386_v38  ;;  %v3749_v38 = vpack.c.bf16 %v557_v32, %v557_v32 }
 0x13a   :  { %2089 = vmatpush1.bf16.msra.mxu1 %v3389_v39  ;;  %2049 = vmatprep.subr.bf16.mxu0 %v3394_v43  ;;  %v3468_v39 = vld [vmem:[#allocation4 + $0x458] ss:$12 sps:$4 sm:$0xff]  }
 0x13b   :  { %2090 = vmatprep.subr.bf16.mxu1 %v3397_v44  ;;  %v3471_v43 = vld [vmem:[#allocation4 + $0x518] ss:$12 sps:$4 sm:$0xff]   ;;  %v3472_v44 = vld [vmem:[#allocation4 + $0x440] ss:$12 sps:$4 sm:$0xff]  }
 0x13d   :  { %2050 = vmatpush1.bf16.msra.mxu0 %v3392_v45  ;;  %v3473_v45 = vld [vmem:[#allocation4 + $0x5c0] ss:$12 sps:$4 sm:$0xff]  }
 0x13e   :  { %2091 = vmatpush1.bf16.msra.mxu1 %v3395_v46  ;;  %2051 = vmatprep.subr.bf16.mxu0 %v3400_v40  ;;  %v3474_v46 = vld [vmem:[#allocation4 + $0x380] ss:$12 sps:$4 sm:$0xff]  }
 0x13f   :  { %2092 = vmatprep.subr.bf16.mxu1 %v3403_v47  ;;  %v3475_v40 = vld [vmem:[#allocation4 + $0x500] ss:$12 sps:$4 sm:$0xff]   ;;  %v3476_v47 = vld [vmem:[#allocation4 + $0x428] ss:$12 sps:$4 sm:$0xff]  }
 0x141   :  { %2052 = vmatpush1.bf16.msra.mxu0 %v3398_v48  ;;  %v3477_v48 = vld [vmem:[#allocation4 + $0x5a8] ss:$12 sps:$4 sm:$0xff]  }
 0x142   :  { %2093 = vmatpush1.bf16.msra.mxu1 %v3401_v49  ;;  %2053 = vmatprep.subr.bf16.mxu0 %v3406_v41  ;;  %v3478_v49 = vld [vmem:[#allocation4 + $0x368] ss:$12 sps:$4 sm:$0xff]   ;;  %v3480_v41 = vld [vmem:[#allocation4 + $0x410] ss:$12 sps:$4 sm:$0xff]  }
 0x143   :  { %2094 = vmatprep.subr.bf16.mxu1 %v3409_v50  ;;  %v3481_v50 = vld [vmem:[#allocation4 + $0x590] ss:$12 sps:$4 sm:$0xff]  }
 0x145   :  { %2054 = vmatpush1.bf16.msra.mxu0 %v3404_v51  ;;  %v3483_v51 = vld [vmem:[#allocation4 + $0x4d0] ss:$12 sps:$4 sm:$0xff]  }
 0x146   :  { %2095 = vmatpush1.bf16.msra.mxu1 %v3407_v52  ;;  %2055 = vmatprep.subr.bf16.mxu0 %v3412_v53  ;;  %v3484_v52 = vld [vmem:[#allocation4 + $0x3f8] ss:$12 sps:$4 sm:$0xff]  }
 0x147   :  { %2096 = vmatprep.subr.bf16.mxu1 %v3415_v57  ;;  %v3485_v53 = vld [vmem:[#allocation4 + $0x578] ss:$12 sps:$4 sm:$0xff]  }
 0x148   :  { %v3486_v57 = vld [vmem:[#allocation4 + $0x338] ss:$12 sps:$4 sm:$0xff]  }
 0x149   :  { %2056 = vmatpush1.bf16.msra.mxu0 %v3410_v59  ;;  %v3487_v59 = vld [vmem:[#allocation4 + $0x4b8] ss:$12 sps:$4 sm:$0xff]  }
 0x14a   :  { %2097 = vmatpush1.bf16.msra.mxu1 %v3413_v61  ;;  %2057 = vmatprep.subr.bf16.mxu0 %v3418_v62  ;;  %v3488_v61 = vld [vmem:[#allocation4 + $0x3e0] ss:$12 sps:$4 sm:$0xff]  }
 0x14b   :  { %2098 = vmatprep.subr.bf16.mxu1 %v3421_v63  ;;  %v3489_v62 = vld [vmem:[#allocation4 + $0x560] ss:$12 sps:$4 sm:$0xff]  }
 0x14c   :  { %v3490_v63 = vld [vmem:[#allocation4 + $0x320] ss:$12 sps:$4 sm:$0xff]  }
 0x14d   :  { %2058 = vmatpush2.bf16.msra.mxu0 %v3416_v0  ;;  %v3491_v0 = vld [vmem:[#allocation4 + $0x4a0] ss:$12 sps:$4 sm:$0xff]  }
 0x14e   :  { %2099 = vmatpush2.bf16.msra.mxu1 %v3419_v1  ;;  %2059 = vmatprep.subr.bf16.mxu0 %v3424_v2  ;;  %v3492_v1 = vld [vmem:[#allocation4 + $0x3c8] ss:$12 sps:$4 sm:$0xff]  }
 0x14f   :  { %2100 = vmatprep.subr.bf16.mxu1 %v3427_v3  ;;  %v3493_v2 = vld [vmem:[#allocation4 + $0x548] ss:$12 sps:$4 sm:$0xff]  }
 0x150   :  { %v3494_v3 = vld [vmem:[#allocation4 + $0x308] ss:$12 sps:$4 sm:$0xff]  }
 0x151   :  { %2060 = vmatpush2.bf16.msra.mxu0 %v3422_v4  ;;  %v3495_v4 = vld [vmem:[#allocation4 + $0x488] ss:$12 sps:$4 sm:$0xff]  }
 0x152   :  { %2101 = vmatpush2.bf16.msra.mxu1 %v3425_v5  ;;  %2061 = vmatprep.subr.bf16.mxu0 %v3430_v6  ;;  %v3496_v5 = vld [vmem:[#allocation6 + $0x138] sm:$0xff]  }
 0x153   :  { %2102 = vmatprep.subr.bf16.mxu1 %v3433_v7  ;;  %v3497_v6 = vld [vmem:[#allocation6 + $0xf8] sm:$0xff]   ;;  %v3498_v7 = vld [vmem:[#allocation6 + $0x130] sm:$0xff]  }
 0x155   :  { %2062 = vmatpush2.bf16.msra.mxu0 %v3428_v8  ;;  %v3499_v8 = vld [vmem:[#allocation6 + $0xf0] sm:$0xff]  }
 0x156   :  { %2103 = vmatpush2.bf16.msra.mxu1 %v3431_v9  ;;  %2063 = vmatprep.subr.bf16.mxu0 %v3436_v10  ;;  %v3500_v9 = vld [vmem:[#allocation6 + $0x128] sm:$0xff]  }
 0x157   :  { %2104 = vmatprep.subr.bf16.mxu1 %v3439_v11  ;;  %v3501_v10 = vld [vmem:[#allocation6 + $0xe8] sm:$0xff]   ;;  %v3502_v11 = vld [vmem:[#allocation6 + $0x120] sm:$0xff]  }
 0x159   :  { %2064 = vmatpush2.bf16.msra.mxu0 %v3434_v12  ;;  %v3503_v12 = vld [vmem:[#allocation6 + $0xe0] sm:$0xff]  }
 0x15a   :  { %2105 = vmatpush2.bf16.msra.mxu1 %v3437_v13  ;;  %2065 = vmatprep.subr.bf16.mxu0 %v3442_v28  ;;  %v3504_v13 = vld [vmem:[#allocation6 + $0x118] sm:$0xff]  }
 0x15b   :  { %2106 = vmatprep.subr.bf16.mxu1 %v3445_v14  ;;  %v3505_v28 = vld [vmem:[#allocation6 + $0xd8] sm:$0xff]   ;;  %v3506_v14 = vld [vmem:[#allocation6 + $0x110] sm:$0xff]  }
 0x15d   :  { %2066 = vmatpush2.bf16.msra.mxu0 %v3440_v15  ;;  %v3507_v15 = vld [vmem:[#allocation6 + $0xd0] sm:$0xff]  }
 0x15e   :  { %2107 = vmatpush2.bf16.msra.mxu1 %v3443_v16  ;;  %2067 = vmatprep.subr.bf16.mxu0 %v3448_v17  ;;  %v3508_v16 = vld [vmem:[#allocation6 + $0x108] sm:$0xff]  }
 0x15f   :  { %2108 = vmatprep.subr.bf16.mxu1 %v3451_v18  ;;  %v3509_v17 = vld [vmem:[#allocation6 + $0xc8] sm:$0xff]   ;;  %v3510_v18 = vld [vmem:[#allocation6 + $0x100] sm:$0xff]  }
 0x161   :  { %2068 = vmatpush2.bf16.msra.mxu0 %v3446_v54  ;;  %v3511_v54 = vld [vmem:[#allocation6 + $0xc0] sm:$0xff]  }
 0x162   :  { %2109 = vmatpush2.bf16.msra.mxu1 %v3449_v19  ;;  %2069 = vmatprep.subr.bf16.mxu0 %v3454_v55  ;;  %v3512_v19 = vld [vmem:[#allocation6 + $0x78] sm:$0xff]   ;;  %v3618_v55 = vmov 0.0  }
 0x163   :  { %2110 = vmatprep.subr.bf16.mxu1 %v3457_v20  ;;  %v3514_v20 = vld [vmem:[#allocation6 + $0x178] sm:$0xff]  }
 0x165   :  { %2070 = vmatpush2.bf16.msra.mxu0 %v3452_v35  ;;  %v3517_v35 = vld [vmem:[#allocation6 + $0x170] sm:$0xff]  }
 0x166   :  { %2111 = vmatpush2.bf16.msra.mxu1 %v3455_v21  ;;  %2071 = vmatprep.subr.bf16.mxu0 %v3460_v22  ;;  %v3520_v21 = vld [vmem:[#allocation6 + $0x168] sm:$0xff]   ;;  %v3523_v22 = vld [vmem:[#allocation6 + $0x160] sm:$0xff]  }
 0x167   :  { %2112 = vmatprep.subr.bf16.mxu1 %v3463_v23  ;;  %v68_v23 = vld [vmem:[%s3806_s5 + $0x8] sm:$0x7] }
 0x169   :  { %2072 = vmatpush2.bf16.msra.mxu0 %v3458_v25  ;;  %v699_v25 = vrot.slane %v68_v23, %v3704_v56 }
 0x16a   :  { %2113 = vmatpush2.bf16.msra.mxu1 %v3461_v29  ;;  %3082 = vmatprep.subr.bf16.mxu0 %v3464_v31  ;;  %v703_v29 = vrot.slane %v68_v23, %v3710_v60 }
 0x16b   :  { %3104 = vmatprep.subr.bf16.mxu1 %v3465_v33 }
 0x16c   :  { %2074 = vmatmul.mubr.bf16.vlgmr.msra.gmra.mxu0 %v3747_v34 }
 0x16d   :  { %2115 = vmatmul.mubr.bf16.vlgmr.msra.gmra.mxu1 %v3749_v38  ;;  %3083 = vmatpush3.bf16.msra.mxu0 %v3466_v30  ;;  %v3529_v30 = vld [vmem:[#allocation6 + $0x150] sm:$0xff]  }
 0x16e   :  { %2155 = vmatprep.mubr.bf16.mxu0 %v3737_v24  ;;  %3105 = vmatpush3.bf16.msra.mxu1 %v3467_v36  ;;  %v3479_v24 = vld [vmem:[#allocation4 + $0x4e8] ss:$12 sps:$4 sm:$0xff]  }
 0x16f   :  { %2195 = vmatprep.mubr.bf16.mxu1 %v3740_v26  ;;  %3084 = vmatprep.subr.bf16.mxu0 %v3468_v39  ;;  %v3482_v26 = vld [vmem:[#allocation4 + $0x350] ss:$12 sps:$4 sm:$0xff]  }
 0x170   :  { %3106 = vmatprep.subr.bf16.mxu1 %v3469_v37 }
 0x171   :  { %3085 = vmatpush3.bf16.msra.mxu0 %v3470_v42 }
 0x172   :  { %3107 = vmatpush3.bf16.msra.mxu1 %v3471_v43  ;;  %3086 = vmatprep.subr.bf16.mxu0 %v3472_v44  ;;  %v3532_v44 = vld [vmem:[#allocation6 + $0x148] sm:$0xff]  }
 0x173   :  { %3108 = vmatprep.subr.bf16.mxu1 %v3473_v45 }
 0x175   :  { %3087 = vmatpush3.bf16.msra.mxu0 %v3474_v46 }
 0x176   :  { %3109 = vmatpush3.bf16.msra.mxu1 %v3475_v40  ;;  %3088 = vmatprep.subr.bf16.mxu0 %v3476_v47  ;;  %v3535_v40 = vld [vmem:[#allocation6 + $0x140] sm:$0xff]  }
 0x177   :  { %3110 = vmatprep.subr.bf16.mxu1 %v3477_v48 }
 0x179   :  { %3089 = vmatpush3.bf16.msra.mxu0 %v3478_v49  ;;  %v707_v49 = vrot.slane %v68_v23, %v3707_v58  ;;  %v3527_v23 = vld [vmem:[#allocation6 + $0x50] sm:$0xff]  }
 0x17a   :  { %3111 = vmatpush3.bf16.msra.mxu1 %v3479_v24  ;;  %3090 = vmatprep.subr.bf16.mxu0 %v3480_v41 }
 0x17b   :  { %3112 = vmatprep.subr.bf16.mxu1 %v3481_v50 }
 0x17d   :  { %3091 = vmatpush3.bf16.msra.mxu0 %v3482_v26 }
 0x17e   :  { %3113 = vmatpush3.bf16.msra.mxu1 %v3483_v51  ;;  %3092 = vmatprep.subr.bf16.mxu0 %v3484_v52 }
 0x17f   :  { %3114 = vmatprep.subr.bf16.mxu1 %v3485_v53 }
 0x181   :  { %3093 = vmatpush3.bf16.msra.mxu0 %v3486_v57 }
 0x182   :  { %3115 = vmatpush3.bf16.msra.mxu1 %v3487_v59  ;;  %3094 = vmatprep.subr.bf16.mxu0 %v3488_v61 }
 0x183   :  { %3116 = vmatprep.subr.bf16.mxu1 %v3489_v62  ;;  %v69_v62 = vld [vmem:[%s3806_s5 + $0xb] sm:$0x7] }
 0x185   :  { %3095 = vmatpush3.bf16.msra.mxu0 %v3490_v63  ;;  %v1517_v63 = vrot.slane %v69_v62, %v3704_v56 }
 0x186   :  { %3117 = vmatpush3.bf16.msra.mxu1 %v3491_v0  ;;  %3096 = vmatprep.subr.bf16.mxu0 %v3492_v1  ;;  %v1521_v0 = vrot.slane %v69_v62, %v3710_v60 }
 0x187   :  { %3118 = vmatprep.subr.bf16.mxu1 %v3493_v2 }
 0x189   :  { %3097 = vmatpush3.bf16.msra.mxu0 %v3494_v3 }
 0x18a   :  { %3119 = vmatpush3.bf16.msra.mxu1 %v3495_v4  ;;  %3126 = vmatprep.subr.bf16.mxu0 %v3496_v5 }
 0x18b   :  { %3188 = vmatprep.subr.bf16.mxu1 %v3618_v55 }
 0x18c   :  { %2156 = vmatmul.mubr.bf16.vlgmr.msra.gmra.mxu0 %v3747_v34 }
 0x18d   :  { %2196 = vmatmul.mubr.bf16.vlgmr.msra.gmra.mxu1 %v3749_v38  ;;  %3127 = vmatpush3.bf16.msra.mxu0 %v3497_v6 }
 0x18e   :  { %3128 = vmatprep.subr.bf16.mxu0 %v3498_v7  ;;  %3189 = vmatpush3.bf16.msra.mxu1 %v3514_v20  ;;  %v3521_v20 = vld [vmem:[#allocation6 + $0x60] sm:$0xff]  }
 0x18f   :  { %3190 = vmatprep.subr.bf16.mxu1 %v3618_v55  ;;  %3204 = vmatprep.mubr.msk.bf16.mxu1 %vm3619_vm1, %v3618_v55 }
 0x191   :  { %3129 = vmatpush3.bf16.msra.mxu0 %v3499_v8 }
 0x192   :  { %3130 = vmatprep.subr.bf16.mxu0 %v3500_v9  ;;  %3191 = vmatpush3.bf16.msra.mxu1 %v3517_v35  ;;  %v3522_v35 = vld [vmem:[#allocation6 + $0x20] sm:$0xff]  }
 0x193   :  { %3192 = vmatprep.subr.bf16.mxu1 %v3618_v55 }
 0x195   :  { %3131 = vmatpush3.bf16.msra.mxu0 %v3501_v10 }
 0x196   :  { %3132 = vmatprep.subr.bf16.mxu0 %v3502_v11  ;;  %3193 = vmatpush3.bf16.msra.mxu1 %v3520_v21  ;;  %v3524_v21 = vld [vmem:[#allocation6 + $0x58] sm:$0xff]  }
 0x197   :  { %3194 = vmatprep.subr.bf16.mxu1 %v3618_v55 }
 0x199   :  { %3133 = vmatpush3.bf16.msra.mxu0 %v3503_v12 }
 0x19a   :  { %3134 = vmatprep.subr.bf16.mxu0 %v3504_v13  ;;  %3195 = vmatpush3.bf16.msra.mxu1 %v3523_v22  ;;  %v3525_v22 = vld [vmem:[#allocation6 + $0x18] sm:$0xff]  }
 0x19b   :  { %3196 = vmatprep.subr.bf16.mxu1 %v3618_v55 }
 0x19d   :  { %3135 = vmatpush3.bf16.msra.mxu0 %v3505_v28 }
 0x19e   :  { %3136 = vmatprep.subr.bf16.mxu0 %v3506_v14  ;;  %3197 = vmatpush3.bf16.msra.mxu1 %v3526_v27  ;;  %v3530_v27 = vld [vmem:[#allocation6 + $0x48] sm:$0xff]  }
 0x19f   :  { %3198 = vmatprep.subr.bf16.mxu1 %v3618_v55 }
 0x1a1   :  { %3137 = vmatpush3.bf16.msra.mxu0 %v3507_v15 }
 0x1a2   :  { %3138 = vmatprep.subr.bf16.mxu0 %v3508_v16  ;;  %3199 = vmatpush3.bf16.msra.mxu1 %v3529_v30  ;;  %v3513_v16 = vld [vmem:[#allocation6 + $0x38] sm:$0xff]  }
 0x1a3   :  { %3200 = vmatprep.subr.bf16.mxu1 %v3618_v55 }
 0x1a5   :  { %3139 = vmatpush3.bf16.msra.mxu0 %v3509_v17  ;;  %v3515_v17 = vld [vmem:[#allocation6 + $0x70] sm:$0xff]  }
 0x1a6   :  { %3140 = vmatprep.subr.bf16.mxu0 %v3510_v18  ;;  %3201 = vmatpush3.bf16.msra.mxu1 %v3532_v44  ;;  %v3516_v18 = vld [vmem:[#allocation6 + $0x30] sm:$0xff]  }
 0x1a7   :  { %3202 = vmatprep.subr.bf16.mxu1 %v3618_v55 }
 0x1a9   :  { %3141 = vmatpush3.bf16.msra.mxu0 %v3511_v54  ;;  %v3518_v54 = vld [vmem:[#allocation6 + $0x68] sm:$0xff]  }
 0x1aa   :  { %3157 = vmatprep.subr.bf16.mxu0 %v3512_v19  ;;  %3203 = vmatpush3.bf16.msra.mxu1 %v3535_v40  ;;  %v3519_v19 = vld [vmem:[#allocation6 + $0x28] sm:$0xff]  }
 0x1ab   :  { %3208 = vmatprep.subr.bf16.mxu1 %v3618_v55 }
 0x1cc   :  { %v1257_v31 = vpop.f32.mrf.mxu0  ;;  %v1298_v33 = vpop.f32.mrf.mxu1 }
 0x1cd   :  { %v1258_v32 = vadd.f32 %v1257_v31, %v699_v25  ;;  %v3528_v25 = vld [vmem:[#allocation6 + $0x10] sm:$0xff]  }
 0x1ce   :  { %v1259_v34 = vpop.f32.mrf.mxu0  ;;  %v1300_v39 = vpop.f32.mrf.mxu1 }
 0x1cf   :  { %v3768_v36 = vadd.f32 %v1298_v33, %v1258_v32  ;;  %v1260_v38 = vadd.f32 %v1259_v34, %v703_v29  ;;  %v1525_v32 = vrot.slane %v69_v62, %v3707_v58  ;;  %v3531_v33 = vld [vmem:[#allocation6 + $0x8] sm:$0xff]   ;;  %v3533_v34 = vld [vmem:[#allocation6 + $0x40] sm:$0xff]  }
 0x1d0   :  { %v1261_v37 = vpop.f32.mrf.mxu0  ;;  %v1302_v43 = vpop.f32.mrf.mxu1 }
 0x1d1   :  { %v1301_v42 = vadd.f32 %v1300_v39, %v1260_v38 }
 0x1d2   :  { %v1262_v45 = vpop.f32.mrf.mxu0  ;;  %v1303_v46 = vpop.f32.mrf.mxu1 }
 0x1d3   :  { %v2204_v13 = vmax.f32 %v1301_v42, 0.0  ;;  %v3534_v45 = vld [vmem:[#allocation6] sm:$0xff]   ;;  %v2203_v46 = vmax.f32 %v3768_v36, 0.0  ;;  %v3538_v36 = vld [vmem:[#allocation6 + $0xa8] sm:$0xff]  }
 0x1d5   :  { %v2207_v60 = vpack.c.bf16 %v2204_v13, %v2204_v13  ;;  %v2206_v58 = vpack.c.bf16 %v2203_v46, %v2203_v46 }
 0x1ec   :  { %v3054_v47 = vpop.f32.mrf.mxu0  ;;  %v3076_v48 = vpop.f32.mrf.mxu1 }
 0x1ee   :  { %v3055_v24 = vpop.f32.mrf.mxu0  ;;  %v3077_v50 = vpop.f32.mrf.mxu1 }
 0x1ef   :  { %v3056_v41 = vadd.f32 %v3055_v24, %v3054_v47  ;;  %v3078_v26 = vadd.f32 %v3077_v50, %v3076_v48  ;;  %v3536_v24 = vld [vmem:[#allocation6 + $0xb8] sm:$0xff]   ;;  %v3537_v50 = vld [vmem:[#allocation6 + $0xb0] sm:$0xff]  }
 0x1f0   :  { %v3057_v51 = vpop.f32.mrf.mxu0  ;;  %v3079_v53 = vpop.f32.mrf.mxu1 }
 0x1f1   :  { %v1340_v52 = vadd.f32 %v3056_v41, %v707_v49  ;;  %v3540_v51 = vld [vmem:[#allocation6 + $0x98] sm:$0xff]   ;;  %v3542_v53 = vld [vmem:[#allocation6 + $0x88] sm:$0xff]  }
 0x1f2   :  { %v3058_v57 = vpop.f32.mrf.mxu0  ;;  %v3080_v61 = vpop.f32.mrf.mxu1 }
 0x1f3   :  { %v3776_v59 = vadd.f32 %v3078_v26, %v1340_v52  ;;  %v3539_v26 = vld [vmem:[#allocation6 + $0xa0] sm:$0xff]   ;;  %v3541_v52 = vld [vmem:[#allocation6 + $0x90] sm:$0xff]  }
 0x1f4   :  { %v3543_v57 = vld [vmem:[#allocation6 + $0x80] sm:$0xff]  }
 0x1f5   :  { %v2205_v61 = vmax.f32 %v3776_v59, 0.0 }
 0x1f7   :  { %v2208_v62 = vpack.c.bf16 %v2205_v61, %v2205_v61 }
 0x22c   :  { %v2075_v1 = vpop.f32.mrf.mxu0 }
 0x22d   :  { %v2076_v2 = vadd.f32 %v2075_v1, %v1517_v63  ;;  %v2116_v3 = vpop.f32.mrf.mxu1 }
 0x22e   :  { %v2077_v4 = vpop.f32.mrf.mxu0 }
 0x22f   :  { %v2117_v5 = vadd.f32 %v2116_v3, %v2076_v2  ;;  %v2078_v6 = vadd.f32 %v2077_v4, %v1521_v0  ;;  %v2118_v7 = vpop.f32.mrf.mxu1 }
 0x230   :  { %v2079_v8 = vpop.f32.mrf.mxu0 }
 0x231   :  { %v2119_v9 = vadd.f32 %v2118_v7, %v2078_v6  ;;  %v2120_v10 = vpop.f32.mrf.mxu1  ;;  %v2209_v11 = vmax.f32 %v2117_v5, 0.0 }
 0x232   :  { %v2080_v12 = vpop.f32.mrf.mxu0 }
 0x233   :  { %v2210_v28 = vmax.f32 %v2119_v9, 0.0  ;;  %v2121_v14 = vpop.f32.mrf.mxu1  ;;  %v2212_v56 = vpack.c.bf16 %v2209_v11, %v2209_v11 }
 0x235   :  { %v2213_v15 = vpack.c.bf16 %v2210_v28, %v2210_v28 }
 0x237   :  { %2487 = vmatprep.mubr.bf16.mxu0 %v2213_v15 }
 0x238   :  { %2488 = vmatmul.mubr.bf16.vlgmr.msra.gmra.mxu0 %v2212_v56 }
 0x239   :  { %3158 = vmatpush3.bf16.msra.mxu0 %v3513_v16  ;;  %2711 = vmatprep.mubr.bf16.mxu0 %v2207_v60 }
 0x23a   :  { %3159 = vmatprep.subr.bf16.mxu0 %v3515_v17 }
 0x23d   :  { %3160 = vmatpush3.bf16.msra.mxu0 %v3516_v18 }
 0x23e   :  { %3161 = vmatprep.subr.bf16.mxu0 %v3518_v54 }
 0x241   :  { %3162 = vmatpush3.bf16.msra.mxu0 %v3519_v19 }
 0x242   :  { %3163 = vmatprep.subr.bf16.mxu0 %v3521_v20 }
 0x245   :  { %3164 = vmatpush3.bf16.msra.mxu0 %v3522_v35 }
 0x246   :  { %3165 = vmatprep.subr.bf16.mxu0 %v3524_v21 }
 0x249   :  { %3166 = vmatpush3.bf16.msra.mxu0 %v3525_v22 }
 0x24a   :  { %3167 = vmatprep.subr.bf16.mxu0 %v3527_v23 }
 0x24c   :  { %v3098_v29 = vpop.f32.mrf.mxu0 }
 0x24d   :  { %v3120_v31 = vpop.f32.mrf.mxu1  ;;  %3168 = vmatpush3.bf16.msra.mxu0 %v3528_v25 }
 0x24e   :  { %v3099_v30 = vpop.f32.mrf.mxu0  ;;  %3169 = vmatprep.subr.bf16.mxu0 %v3530_v27 }
 0x24f   :  { %v3100_v38 = vadd.f32 %v3099_v30, %v3098_v29  ;;  %v3121_v39 = vpop.f32.mrf.mxu1 }
 0x250   :  { %v3101_v37 = vpop.f32.mrf.mxu0  ;;  %v3122_v43 = vadd.f32 %v3121_v39, %v3120_v31 }
 0x251   :  { %v2158_v42 = vadd.f32 %v3100_v38, %v1525_v32  ;;  %v3123_v44 = vpop.f32.mrf.mxu1  ;;  %3170 = vmatpush3.bf16.msra.mxu0 %v3531_v33 }
 0x252   :  { %v3102_v40 = vpop.f32.mrf.mxu0  ;;  %3171 = vmatprep.subr.bf16.mxu0 %v3533_v34 }
 0x253   :  { %v2198_v47 = vadd.f32 %v3122_v43, %v2158_v42  ;;  %v3124_v48 = vpop.f32.mrf.mxu1 }
 0x255   :  { %v2211_v49 = vmax.f32 %v2198_v47, 0.0  ;;  %3172 = vmatpush3.bf16.msra.mxu0 %v3534_v45 }
 0x257   :  { %v2214_v41 = vpack.c.bf16 %v2211_v49, %v2211_v49 }
 0x258   :  { %2712 = vmatmul.mubr.bf16.vlgmr.msra.gmra.mxu0 %v2206_v58 }
 0x259   :  { %3205 = vmatmul.mubr.bf16.vlgmr.msra.gmra.mxu1 %v2214_v41 }
 0x25a   :  { %3209 = vmatpush3.bf16.msra.mxu1 %v3536_v24  ;;  %3224 = vmatprep.mubr.msk.bf16.mxu1 %vm3619_vm1, %v3618_v55 }
 0x25b   :  { %3210 = vmatprep.subr.bf16.mxu1 %v3618_v55 }
 0x25e   :  { %3211 = vmatpush3.bf16.msra.mxu1 %v3537_v50 }
 0x25f   :  { %3212 = vmatprep.subr.bf16.mxu1 %v3618_v55 }
 0x262   :  { %3213 = vmatpush3.bf16.msra.mxu1 %v3538_v36 }
 0x263   :  { %3214 = vmatprep.subr.bf16.mxu1 %v3618_v55 }
 0x266   :  { %3215 = vmatpush3.bf16.msra.mxu1 %v3539_v26 }
 0x267   :  { %3216 = vmatprep.subr.bf16.mxu1 %v3618_v55 }
 0x26a   :  { %3217 = vmatpush3.bf16.msra.mxu1 %v3540_v51 }
 0x26b   :  { %3218 = vmatprep.subr.bf16.mxu1 %v3618_v55 }
 0x26e   :  { %3219 = vmatpush3.bf16.msra.mxu1 %v3541_v52 }
 0x26f   :  { %3220 = vmatprep.subr.bf16.mxu1 %v3618_v55 }
 0x272   :  { %3221 = vmatpush3.bf16.msra.mxu1 %v3542_v53 }
 0x273   :  { %3222 = vmatprep.subr.bf16.mxu1 %v3618_v55  ;;  %v3037_v55 = vld [vmem:[%s3806_s5 + $0xe] ss:$0 sm:$0xff] }
 0x276   :  { %3223 = vmatpush3.bf16.msra.mxu1 %v3543_v57 }
 0x279   :  { %3225 = vmatmul.mubr.bf16.vlgmr.msra.gmra.mxu1 %v2208_v62 }
 0x2f8   :  { %v3142_v63 = vpop.f32.mrf.mxu0 }
 0x2fa   :  { %v3143_v0 = vpop.f32.mrf.mxu0 }
 0x2fb   :  { %v3144_v11 = vadd.f32 %v3143_v0, %v3142_v63 }
 0x2fc   :  { %v3145_v1 = vpop.f32.mrf.mxu0 }
 0x2fe   :  { %v3146_v2 = vpop.f32.mrf.mxu0 }
 0x318   :  { %v3173_v3 = vpop.f32.mrf.mxu0 }
 0x319   :  { %v2529_v4 = vpop.f32.mrf.mxu1 }
 0x31a   :  { %v3174_v5 = vpop.f32.mrf.mxu0  ;;  %v2530_v12 = vadd.f32 %v3144_v11, %v2529_v4 }
 0x31b   :  { %v3206_v6 = vpop.f32.mrf.mxu1  ;;  %v3175_v59 = vadd.f32 %v3174_v5, %v3173_v3 }
 0x31c   :  { %v3176_v7 = vpop.f32.mrf.mxu0 }
 0x31d   :  { %v2532_v8 = vpop.f32.mrf.mxu1  ;;  %v2714_v13 = vadd.f32 %v3175_v59, %v2530_v12 }
 0x31e   :  { %v3177_v9 = vpop.f32.mrf.mxu0 }
 0x31f   :  { %v3207_v10 = vpop.f32.mrf.mxu1 }
 0x339   :  { %v2753_v28 = vpop.f32.mrf.mxu1 }
 0x33a   :  { %v2754_v14 = vadd.f32 %v2753_v28, %v2714_v13 }
 0x33b   :  { %v3226_v15 = vpop.f32.mrf.mxu1 }
 0x33c   :  { %v2765_v16 = vadd.f32 %v3037_v55, %v2754_v14 }
 0x33d   :  { %v2756_v56 = vpop.f32.mrf.mxu1 }
 0x33e   :  { %2766 = vst [vmem:[%s3807_s6] sm:$0xff] %v2765_v16 }
 0x33f   :  { %v3227_v17 = vpop.f32.mrf.mxu1 }
 0x340   :  { %2771 = vsyncpa [#allocation3], 1 }
 0x341   :  { %2772 = vsyncpa [#allocation5], 1 }

</bundles_post_ra>
